<compile_context>
chip_gen: v7x
topology: tpu7x:2x2x1
jax: 0.10.0
libtpu: 0.0.40
codegen_flags: <defaults>
</compile_context>

<pallas_src>
import jax
import jax.numpy as jnp
from jax.experimental import pallas as pl
from jax.experimental.pallas import tpu as pltpu

LN_EPS = 1e-5     # torch.nn.LayerNorm default
PAD_LENGTH = 512  # NoGraphMixer pad_length
HIDDEN = 64       # NoGraphMixer hidden_dim


# ---------------------------------------------------------------------------
# in-kernel math helpers (traced inside the Pallas kernel)
# ---------------------------------------------------------------------------
def _erf(x):
    # Abramowitz & Stegun 7.1.26 (max abs err ~1.5e-7). Mosaic has no native
    # erf lowering, so inline it; matches torch's exact-erf GELU to ~f32 eps.
    a1, a2, a3, a4, a5 = (0.254829592, -0.284496736, 1.421413741,
                          -1.453152027, 1.061405429)
    p = 0.3275911
    sgn = jnp.where(x >= 0.0, 1.0, -1.0)
    ax = jnp.abs(x)
    t = 1.0 / (1.0 + p * ax)
    poly = ((((a5 * t + a4) * t + a3) * t + a2) * t + a1) * t
    return sgn * (1.0 - poly * jnp.exp(-ax * ax))


def _gelu(x):
    # torch.nn.GELU() (exact / erf formulation)
    return 0.5 * x * (1.0 + _erf(x * 0.7071067811865476))


def _layernorm_packed(v, g, b, gmat, inv_cnt):
    # torch LayerNorm([T, dim]) per stock; stocks live in lane groups of `dim`.
    # gmat = kron(I_p, ones(dim, dim)) broadcasts each group's lane-sum back.
    mu = jnp.sum(jnp.dot(v, gmat, preferred_element_type=jnp.float32),
                 axis=0, keepdims=True) * inv_cnt
    c = v - mu
    var = jnp.sum(jnp.dot(c * c, gmat, preferred_element_type=jnp.float32),
                  axis=0, keepdims=True) * inv_cnt
    return c * jax.lax.rsqrt(var + LN_EPS) * g + b


def _mixer_packed(inp, g1, b1, g2, b2, bt, wt, w1, b1r, w2, b2r, gmat, inv_cnt):
    # Mixer2dTriU on a (T, p*dim) lane-packed slab: shared lower-triangular
    # time mix + block-diagonal (kron(I_p, .)) channel MLP with exact GELU.
    x1 = _layernorm_packed(inp, g1, b1, gmat, inv_cnt)
    tm = jnp.dot(wt, x1, preferred_element_type=jnp.float32) + bt
    x2 = _layernorm_packed(tm + inp, g2, b2, gmat, inv_cnt)
    h = _gelu(jnp.dot(x2, w1, preferred_element_type=jnp.float32) + b1r)
    y = jnp.dot(h, w2, preferred_element_type=jnp.float32) + b2r
    return x2 + y


# ---------------------------------------------------------------------------
# fused kernel: conv + both Mixer2dTriU blocks + channel_fc + trimmed
# NoGraphMixer/time_fc head.  One batch element per grid step, all its stocks
# packed on the lane axis.
# ---------------------------------------------------------------------------
def _stockmixer_kernel(xp_ref, seg_ref,
                       wt_main_ref, ln_main_ref, wt_scale_ref, ln_scale_ref,
                       blk_ref, wconv_ref, rows_ref, wsel_ref,
                       wd1t_ref, bd1_ref, wd2col_ref, wtf_ref, bias_ref,
                       out_ref):
    seq = xp_ref.shape[1]
    lanes = xp_ref.shape[2]
    scale_dim = seg_ref.shape[1]
    p = wsel_ref.shape[1]
    dim = lanes // p

    xp = xp_ref[0]            # (seq, p*dim)
    seg = seg_ref[0]          # (scale_dim, 4*p*dim)
    gmat = blk_ref[4]         # (p*dim, p*dim) lane-group-sum matrix

    # Conv1d(dim, dim, kernel=4, stride=4) as one block-diagonal matmul.
    conv = (jnp.dot(seg, wconv_ref[...], preferred_element_type=jnp.float32)
            + rows_ref[4])                                   # (scale_dim, p*dim)

    scale_out = _mixer_packed(
        conv, ln_scale_ref[0], ln_scale_ref[1], ln_scale_ref[2],
        ln_scale_ref[3], ln_scale_ref[4], wt_scale_ref[...],
        blk_ref[2], rows_ref[2], blk_ref[3], rows_ref[3],
        gmat, 1.0 / (scale_dim * dim))
    main_out = _mixer_packed(
        xp, ln_main_ref[0], ln_main_ref[1], ln_main_ref[2],
        ln_main_ref[3], ln_main_ref[4], wt_main_ref[...],
        blk_ref[0], rows_ref[0], blk_ref[1], rows_ref[1],
        gmat, 1.0 / (seq * dim))

    # channel_fc on cat([inputs, main, scale], time) for every stock at once.
    # a_mat[f, s] = y_raw[b, s, f] - channel_fc_bias (bias folded downstream).
    slab = jnp.concatenate([xp, main_out, scale_out], axis=0)   # (Y, p*dim)
    a_mat = jnp.dot(slab, wsel_ref[...],
                    preferred_element_type=jnp.float32)         # (Y, p)

    # NoGraphMixer + time_fc / time_fc_, trimmed to the only consumed row
    # (y + z)[:, -1].  Hardswish on the hidden activations.
    h = (jnp.dot(a_mat, wd1t_ref[...], preferred_element_type=jnp.float32)
         + bd1_ref[...])                                        # (Y, hidden)
    hs = h * jnp.clip(h + 3.0, 0.0, 6.0) * (1.0 / 6.0)
    z_col = jnp.dot(hs, wd2col_ref[...],
                    preferred_element_type=jnp.float32)         # (Y, 1)
    y_last = a_mat[:, p - 1:p]                                  # (Y, 1)
    out_col = (jnp.dot(wtf_ref[0], y_last, preferred_element_type=jnp.float32)
               + jnp.dot(wtf_ref[1], z_col, preferred_element_type=jnp.float32)
               + bias_ref[...])                                 # (dpad, 1)
    out_ref[0] = out_col


# ---------------------------------------------------------------------------
# wrapper
# ---------------------------------------------------------------------------
def stockmixer_forward(x, params):
    batch, p, seq, dim = x.shape
    assert seq % 4 == 0
    scale_dim = seq // 4
    lanes = p * dim
    dpad = params["bias"].shape[0]

    # lane-packed input: xp[b, t, s*dim + d] = x[b, s, t, d]
    xp = jnp.transpose(x, (0, 2, 1, 3)).reshape(batch, seq, lanes)
    # conv segments: seg[b, tau, s*4*dim + k*dim + d] = x[b, s, 4*tau + k, d]
    seg = jnp.transpose(x.reshape(batch, p, scale_dim, 4 * dim),
                        (0, 2, 1, 3)).reshape(batch, scale_dim, 4 * lanes)

    order = ("wt_main", "ln_main", "wt_scale", "ln_scale", "blk", "wconv",
             "rows", "wsel", "wd1t", "bd1", "wd2col", "wtf", "bias")
    weights = [params[k] for k in order]

    def const_spec(a):
        nd = a.ndim
        return pl.BlockSpec(a.shape, lambda b, nd=nd: (0,) * nd)

    out = pl.pallas_call(
        _stockmixer_kernel,
        out_shape=jax.ShapeDtypeStruct((batch, dpad, 1), jnp.float32),
        grid=(batch,),
        in_specs=[pl.BlockSpec((1, seq, lanes), lambda b: (b, 0, 0)),
                  pl.BlockSpec((1, scale_dim, 4 * lanes), lambda b: (b, 0, 0))]
                 + [const_spec(a) for a in weights],
        out_specs=pl.BlockSpec((1, dpad, 1), lambda b: (b, 0, 0)),
        compiler_params=pltpu.CompilerParams(
            dimension_semantics=("parallel",)),
    )(xp, seg, *weights)

    return out[:, :dim, 0]      # == (time_fc(y) + time_fc_(z))[:, -1]


# ---------------------------------------------------------------------------
# parameters: torch-shaped raw params + packing into the kernel layout
# ---------------------------------------------------------------------------
def init_torch_params(key, dim, seq, p, pad_length=PAD_LENGTH, hidden=HIDDEN):
    scale_dim = seq // 4
    y_dim = 2 * seq + scale_dim
    keys = iter(jax.random.split(key, 48))

    def unif(shape, fan_in):
        bound = 1.0 / float(fan_in) ** 0.5
        return jax.random.uniform(next(keys), shape, jnp.float32, -bound, bound)

    def mixer(T):
        return dict(
            ln1_g=jnp.ones((T, dim), jnp.float32),
            ln1_b=jnp.zeros((T, dim), jnp.float32),
            ln2_g=jnp.ones((T, dim), jnp.float32),
            ln2_b=jnp.zeros((T, dim), jnp.float32),
            tw=jnp.tril(unif((T, T), T)),      # TriU row t = Linear(t+1, 1)
            tb=unif((T,), T),
            w1=unif((dim, dim), dim),          # torch Linear weight (out, in)
            b1=unif((dim,), dim),
            w2=unif((dim, dim), dim),
            b2=unif((dim,), dim),
        )

    return dict(
        conv_w=unif((dim, dim, 4), 4 * dim),   # Conv1d weight (out, in, k)
        conv_b=unif((dim,), 4 * dim),
        main=mixer(seq),
        scale=mixer(scale_dim),
        cfc_w=unif((1, dim), dim),             # channel_fc
        cfc_b=unif((1,), dim),
        tfc_w=unif((dim, y_dim), y_dim),       # time_fc
        tfc_b=unif((dim,), y_dim),
        tfc2_w=unif((dim, y_dim), y_dim),      # time_fc_
        tfc2_b=unif((dim,), y_dim),
        d1_w=unif((hidden, pad_length), pad_length),   # NoGraphMixer dense1
        d1_b=unif((hidden,), pad_length),
        d2_w=unif((pad_length, hidden), hidden),       # NoGraphMixer dense2
        d2_b=unif((pad_length,), hidden),
    )


def pack_params(raw, p, dim, seq, pad_length=PAD_LENGTH):
    scale_dim = seq // 4
    lanes = p * dim
    dpad = -(-dim // 8) * 8
    eye_p = jnp.eye(p, dtype=jnp.float32)

    def tile_lanes(a):                       # (T, dim) -> (T, p*dim)
        return jnp.tile(a, (1, p))

    def pack_mixer(m, T):
        ln = jnp.stack([tile_lanes(m["ln1_g"]), tile_lanes(m["ln1_b"]),
                        tile_lanes(m["ln2_g"]), tile_lanes(m["ln2_b"]),
                        jnp.tile(m["tb"].reshape(T, 1), (1, lanes))], axis=0)
        w1blk = jnp.kron(eye_p, m["w1"].T)   # torch Linear: x @ W.T
        w2blk = jnp.kron(eye_p, m["w2"].T)
        b1row = tile_lanes(m["b1"].reshape(1, dim))
        b2row = tile_lanes(m["b2"].reshape(1, dim))
        return ln, jnp.tril(m["tw"]), w1blk, b1row, w2blk, b2row

    ln_m, wt_m, w1m, b1m, w2m, b2m = pack_mixer(raw["main"], seq)
    ln_s, wt_s, w1s, b1s, w2s, b2s = pack_mixer(raw["scale"], scale_dim)

    # Conv1d as a block-diagonal matmul over (scale_dim, p*4*dim) segments.
    wc = jnp.transpose(raw["conv_w"], (2, 1, 0)).reshape(4 * dim, dim)
    wconv = jnp.kron(eye_p, wc)                                   # (4*lanes, lanes)
    bconv = tile_lanes(raw["conv_b"].reshape(1, dim))

    gmat = jnp.kron(eye_p, jnp.ones((dim, dim), jnp.float32))     # LN group sums

    # channel_fc for all stocks in one matmul (its bias is folded below).
    wsel = jnp.kron(eye_p, raw["cfc_w"].reshape(dim, 1))          # (lanes, p)
    bcf = raw["cfc_b"][0]

    # Head trimmed to the only consumed row (y + z)[:, -1]:
    #  * NoGraphMixer left-pads to 512 and un-pads with the last p rows, so
    #    only the last p columns of dense1 and padded row 511 of dense2 live.
    #  * channel_fc / dense2 scalar biases fold into bd1 / the output bias.
    wd1t = raw["d1_w"][:, pad_length - p:].T                      # (p, hidden)
    bd1 = (raw["d1_b"].reshape(1, -1)
           + bcf * jnp.sum(wd1t, axis=0, keepdims=True))          # (1, hidden)
    wd2col = raw["d2_w"][pad_length - 1, :].reshape(-1, 1)        # (hidden, 1)
    bd2_last = raw["d2_b"][pad_length - 1]

    def pad_rows(a):                          # (dim, ...) -> (dpad, ...)
        if dpad == dim:
            return a
        return jnp.concatenate(
            [a, jnp.zeros((dpad - dim,) + a.shape[1:], a.dtype)], axis=0)

    wtf = jnp.stack([pad_rows(raw["tfc_w"]), pad_rows(raw["tfc2_w"])], axis=0)
    bias = pad_rows((raw["tfc_b"] + raw["tfc2_b"]
                     + bcf * jnp.sum(raw["tfc_w"], axis=1)
                     + bd2_last * jnp.sum(raw["tfc2_w"], axis=1)
                     ).reshape(dim, 1))

    return dict(
        wt_main=wt_m,
        ln_main=ln_m,                                      # (5, seq, lanes)
        wt_scale=wt_s,
        ln_scale=ln_s,                                     # (5, scale_dim, lanes)
        blk=jnp.stack([w1m, w2m, w1s, w2s, gmat], axis=0),  # (5, lanes, lanes)
        wconv=wconv,
        rows=jnp.stack([b1m, b2m, b1s, b2s, bconv], axis=0),  # (5, 1, lanes)
        wsel=wsel,
        wd1t=wd1t,
        bd1=bd1,
        wd2col=wd2col,
        wtf=wtf,                                            # (2, dpad, Y)
        bias=bias,                                          # (dpad, 1)
    )


# ---------------------------------------------------------------------------
# pure-JAX reference (straight transcription of StockMixer.forward)
# ---------------------------------------------------------------------------
def reference_forward(x, raw, pad_length=PAD_LENGTH):
    hp = dict(precision=jax.lax.Precision.HIGHEST)
    batch, p, seq, dim = x.shape
    scale_dim = seq // 4
    n = batch * p

    rx = x.reshape(n, seq, dim)
    seg = rx.reshape(n, scale_dim, 4, dim)
    conv = jnp.einsum("nski,oik->nso", seg, raw["conv_w"], **hp) + raw["conv_b"]

    def layernorm(v, g, b):
        mu = jnp.mean(v, axis=(1, 2), keepdims=True)
        var = jnp.mean((v - mu) ** 2, axis=(1, 2), keepdims=True)
        return (v - mu) / jnp.sqrt(var + LN_EPS) * g + b

    def mixer(inp, m):
        x1 = layernorm(inp, m["ln1_g"], m["ln1_b"])
        tm = (jnp.einsum("ts,nsc->ntc", jnp.tril(m["tw"]), x1, **hp)
              + m["tb"][None, :, None])
        x2 = layernorm(tm + inp, m["ln2_g"], m["ln2_b"])
        h = jax.nn.gelu(jnp.einsum("ntc,oc->nto", x2, m["w1"], **hp) + m["b1"],
                        approximate=False)
        y = jnp.einsum("nto,co->ntc", h, m["w2"], **hp) + m["b2"]
        return x2 + y

    cat = jnp.concatenate(
        [rx, mixer(rx, raw["main"]), mixer(conv, raw["scale"])], axis=1)
    y = (jnp.einsum("nfd,od->nfo", cat, raw["cfc_w"], **hp)[..., 0]
         + raw["cfc_b"][0])
    y = y.reshape(batch, p, -1)

    t = jnp.transpose(y, (0, 2, 1))
    t = jnp.concatenate(
        [jnp.zeros((batch, t.shape[1], pad_length - p), t.dtype), t], axis=2)
    t = jnp.einsum("bfp,hp->bfh", t, raw["d1_w"], **hp) + raw["d1_b"]
    t = t * jnp.clip(t + 3.0, 0.0, 6.0) / 6.0            # Hardswish
    t = jnp.einsum("bfh,ph->bfp", t, raw["d2_w"], **hp) + raw["d2_b"]
    z = jnp.transpose(t[:, :, -p:], (0, 2, 1))

    yo = jnp.einsum("bpf,of->bpo", y, raw["tfc_w"], **hp) + raw["tfc_b"]
    zo = jnp.einsum("bpf,of->bpo", z, raw["tfc2_w"], **hp) + raw["tfc2_b"]
    return (yo + zo)[:, -1]


if __name__ == "__main__":
    # seq must be 64: StockMixer hard-codes scale_dim=16 with Conv1d stride 4.
    batch, p, seq, dim = 2, 8, 64, 4
    key = jax.random.PRNGKey(0)
    kx, kp = jax.random.split(key)
    x = jax.random.normal(kx, (batch, p, seq, dim), jnp.float32)

    raw = init_torch_params(kp, dim=dim, seq=seq, p=p)
    params = pack_params(raw, p=p, dim=dim, seq=seq)

    fwd = jax.jit(stockmixer_forward)
    out = jax.block_until_ready(fwd(x, params))

    assert out.shape == (batch, dim), out.shape
    assert bool(jnp.all(jnp.isfinite(out)))

    ref = reference_forward(x, raw)
    err = float(jnp.max(jnp.abs(out - ref)))
    scale = float(jnp.max(jnp.abs(ref))) + 1e-6
    assert err / scale < 2e-3, (err, scale)

    print("KERNEL_OK")
</pallas_src>

<mosaic_0001>
module attributes {stable_mosaic.version = 11 : i64} {
  func.func @_stockmixer_kernel(%arg0: i32, %arg1: memref<1x64x32xf32, #tpu.memory_space<vmem>>, %arg2: memref<1x16x128xf32, #tpu.memory_space<vmem>>, %arg3: memref<64x64xf32, #tpu.memory_space<vmem>>, %arg4: memref<5x64x32xf32, #tpu.memory_space<vmem>>, %arg5: memref<16x16xf32, #tpu.memory_space<vmem>>, %arg6: memref<5x16x32xf32, #tpu.memory_space<vmem>>, %arg7: memref<5x32x32xf32, #tpu.memory_space<vmem>>, %arg8: memref<128x32xf32, #tpu.memory_space<vmem>>, %arg9: memref<5x1x32xf32, #tpu.memory_space<vmem>>, %arg10: memref<32x8xf32, #tpu.memory_space<vmem>>, %arg11: memref<8x64xf32, #tpu.memory_space<vmem>>, %arg12: memref<1x64xf32, #tpu.memory_space<vmem>>, %arg13: memref<64x1xf32, #tpu.memory_space<vmem>>, %arg14: memref<2x8x144xf32, #tpu.memory_space<vmem>>, %arg15: memref<8x1xf32, #tpu.memory_space<vmem>>, %arg16: memref<1x8x1xf32, #tpu.memory_space<vmem>>) attributes {dimension_semantics = [#tpu.dimension_semantics<parallel>], iteration_bounds = array<i64: 2>, scalar_prefetch = 0 : i64, scratch_operands = 0 : i64, tpu.core_type = #tpu.core_type<tc>, window_params = [{transform_indices = @transform_0, window_bounds = array<i64: 1, 64, 32>}, {transform_indices = @transform_1, window_bounds = array<i64: 1, 16, 128>}, {pipeline_mode = #tpu.pipeline_mode<synchronous>, transform_indices = @transform_2, window_bounds = array<i64: 64, 64>}, {pipeline_mode = #tpu.pipeline_mode<synchronous>, transform_indices = @transform_3, window_bounds = array<i64: 5, 64, 32>}, {pipeline_mode = #tpu.pipeline_mode<synchronous>, transform_indices = @transform_4, window_bounds = array<i64: 16, 16>}, {pipeline_mode = #tpu.pipeline_mode<synchronous>, transform_indices = @transform_5, window_bounds = array<i64: 5, 16, 32>}, {pipeline_mode = #tpu.pipeline_mode<synchronous>, transform_indices = @transform_6, window_bounds = array<i64: 5, 32, 32>}, {pipeline_mode = #tpu.pipeline_mode<synchronous>, transform_indices = @transform_7, window_bounds = array<i64: 128, 32>}, {pipeline_mode = #tpu.pipeline_mode<synchronous>, transform_indices = @transform_8, window_bounds = array<i64: 5, 1, 32>}, {pipeline_mode = #tpu.pipeline_mode<synchronous>, transform_indices = @transform_9, window_bounds = array<i64: 32, 8>}, {pipeline_mode = #tpu.pipeline_mode<synchronous>, transform_indices = @transform_10, window_bounds = array<i64: 8, 64>}, {pipeline_mode = #tpu.pipeline_mode<synchronous>, transform_indices = @transform_11, window_bounds = array<i64: 1, 64>}, {pipeline_mode = #tpu.pipeline_mode<synchronous>, transform_indices = @transform_12, window_bounds = array<i64: 64, 1>}, {pipeline_mode = #tpu.pipeline_mode<synchronous>, transform_indices = @transform_13, window_bounds = array<i64: 2, 8, 144>}, {pipeline_mode = #tpu.pipeline_mode<synchronous>, transform_indices = @transform_14, window_bounds = array<i64: 8, 1>}, {transform_indices = @transform_15, window_bounds = array<i64: 1, 8, 1>}]} {
    %c0 = arith.constant 0 : index
    %c0_0 = arith.constant 0 : index
    %c0_1 = arith.constant 0 : index
    %0 = vector.load %arg1[%c0, %c0_0, %c0_1] : memref<1x64x32xf32, #tpu.memory_space<vmem>>, vector<1x64x32xf32>
    %1 = vector.shape_cast %0 : vector<1x64x32xf32> to vector<64x32xf32>
    %c0_2 = arith.constant 0 : index
    %c0_3 = arith.constant 0 : index
    %c0_4 = arith.constant 0 : index
    %2 = vector.load %arg2[%c0_2, %c0_3, %c0_4] : memref<1x16x128xf32, #tpu.memory_space<vmem>>, vector<1x16x128xf32>
    %3 = vector.shape_cast %2 : vector<1x16x128xf32> to vector<16x128xf32>
    %c4 = arith.constant 4 : index
    %c0_5 = arith.constant 0 : index
    %c0_6 = arith.constant 0 : index
    %4 = vector.load %arg7[%c4, %c0_5, %c0_6] : memref<5x32x32xf32, #tpu.memory_space<vmem>>, vector<1x32x32xf32>
    %5 = vector.shape_cast %4 : vector<1x32x32xf32> to vector<32x32xf32>
    %c0_7 = arith.constant 0 : index
    %c0_8 = arith.constant 0 : index
    %6 = vector.load %arg8[%c0_7, %c0_8] : memref<128x32xf32, #tpu.memory_space<vmem>>, vector<128x32xf32>
    %cst = arith.constant dense<0.000000e+00> : vector<16x32xf32>
    %7 = tpu.matmul %3, %6, %cst {dimension_numbers = #tpu.dot_dimension_numbers<[1], [0], [0], [1], [0, 0, 1, 1], [], []>} : vector<16x128xf32>, vector<128x32xf32>, vector<16x32xf32> -> vector<16x32xf32>
    %c4_9 = arith.constant 4 : index
    %c0_10 = arith.constant 0 : index
    %c0_11 = arith.constant 0 : index
    %8 = vector.load %arg9[%c4_9, %c0_10, %c0_11] : memref<5x1x32xf32, #tpu.memory_space<vmem>>, vector<1x1x32xf32>
    %9 = vector.shape_cast %8 : vector<1x1x32xf32> to vector<1x32xf32>
    %10 = vector.broadcast %9 : vector<1x32xf32> to vector<16x32xf32>
    %11 = arith.addf %7, %10 : vector<16x32xf32>
    %c0_12 = arith.constant 0 : index
    %c0_13 = arith.constant 0 : index
    %c0_14 = arith.constant 0 : index
    %12 = vector.load %arg6[%c0_12, %c0_13, %c0_14] : memref<5x16x32xf32, #tpu.memory_space<vmem>>, vector<1x16x32xf32>
    %13 = vector.shape_cast %12 : vector<1x16x32xf32> to vector<16x32xf32>
    %c1 = arith.constant 1 : index
    %c0_15 = arith.constant 0 : index
    %c0_16 = arith.constant 0 : index
    %14 = vector.load %arg6[%c1, %c0_15, %c0_16] : memref<5x16x32xf32, #tpu.memory_space<vmem>>, vector<1x16x32xf32>
    %15 = vector.shape_cast %14 : vector<1x16x32xf32> to vector<16x32xf32>
    %c2 = arith.constant 2 : index
    %c0_17 = arith.constant 0 : index
    %c0_18 = arith.constant 0 : index
    %16 = vector.load %arg6[%c2, %c0_17, %c0_18] : memref<5x16x32xf32, #tpu.memory_space<vmem>>, vector<1x16x32xf32>
    %17 = vector.shape_cast %16 : vector<1x16x32xf32> to vector<16x32xf32>
    %c3 = arith.constant 3 : index
    %c0_19 = arith.constant 0 : index
    %c0_20 = arith.constant 0 : index
    %18 = vector.load %arg6[%c3, %c0_19, %c0_20] : memref<5x16x32xf32, #tpu.memory_space<vmem>>, vector<1x16x32xf32>
    %19 = vector.shape_cast %18 : vector<1x16x32xf32> to vector<16x32xf32>
    %c4_21 = arith.constant 4 : index
    %c0_22 = arith.constant 0 : index
    %c0_23 = arith.constant 0 : index
    %20 = vector.load %arg6[%c4_21, %c0_22, %c0_23] : memref<5x16x32xf32, #tpu.memory_space<vmem>>, vector<1x16x32xf32>
    %21 = vector.shape_cast %20 : vector<1x16x32xf32> to vector<16x32xf32>
    %c0_24 = arith.constant 0 : index
    %c0_25 = arith.constant 0 : index
    %22 = vector.load %arg5[%c0_24, %c0_25] : memref<16x16xf32, #tpu.memory_space<vmem>>, vector<16x16xf32>
    %c2_26 = arith.constant 2 : index
    %c0_27 = arith.constant 0 : index
    %c0_28 = arith.constant 0 : index
    %23 = vector.load %arg7[%c2_26, %c0_27, %c0_28] : memref<5x32x32xf32, #tpu.memory_space<vmem>>, vector<1x32x32xf32>
    %24 = vector.shape_cast %23 : vector<1x32x32xf32> to vector<32x32xf32>
    %c2_29 = arith.constant 2 : index
    %c0_30 = arith.constant 0 : index
    %c0_31 = arith.constant 0 : index
    %25 = vector.load %arg9[%c2_29, %c0_30, %c0_31] : memref<5x1x32xf32, #tpu.memory_space<vmem>>, vector<1x1x32xf32>
    %26 = vector.shape_cast %25 : vector<1x1x32xf32> to vector<1x32xf32>
    %c3_32 = arith.constant 3 : index
    %c0_33 = arith.constant 0 : index
    %c0_34 = arith.constant 0 : index
    %27 = vector.load %arg7[%c3_32, %c0_33, %c0_34] : memref<5x32x32xf32, #tpu.memory_space<vmem>>, vector<1x32x32xf32>
    %28 = vector.shape_cast %27 : vector<1x32x32xf32> to vector<32x32xf32>
    %c3_35 = arith.constant 3 : index
    %c0_36 = arith.constant 0 : index
    %c0_37 = arith.constant 0 : index
    %29 = vector.load %arg9[%c3_35, %c0_36, %c0_37] : memref<5x1x32xf32, #tpu.memory_space<vmem>>, vector<1x1x32xf32>
    %30 = vector.shape_cast %29 : vector<1x1x32xf32> to vector<1x32xf32>
    %cst_38 = arith.constant dense<0.000000e+00> : vector<16x32xf32>
    %31 = tpu.matmul %11, %5, %cst_38 {dimension_numbers = #tpu.dot_dimension_numbers<[1], [0], [0], [1], [0, 0, 1, 1], [], []>} : vector<16x32xf32>, vector<32x32xf32>, vector<16x32xf32> -> vector<16x32xf32>
    %cst_39 = arith.constant dense<0.000000e+00> : vector<32xf32>
    %32 = vector.multi_reduction <add>, %31, %cst_39 [0] : vector<16x32xf32> to vector<32xf32>
    %33 = vector.shape_cast %32 : vector<32xf32> to vector<1x32xf32>
    %cst_40 = arith.constant 1.562500e-02 : f32
    %34 = vector.broadcast %cst_40 : f32 to vector<1x32xf32>
    %35 = arith.mulf %33, %34 : vector<1x32xf32>
    %36 = vector.broadcast %35 : vector<1x32xf32> to vector<16x32xf32>
    %37 = arith.subf %11, %36 : vector<16x32xf32>
    %38 = arith.mulf %37, %37 : vector<16x32xf32>
    %cst_41 = arith.constant dense<0.000000e+00> : vector<16x32xf32>
    %39 = tpu.matmul %38, %5, %cst_41 {dimension_numbers = #tpu.dot_dimension_numbers<[1], [0], [0], [1], [0, 0, 1, 1], [], []>} : vector<16x32xf32>, vector<32x32xf32>, vector<16x32xf32> -> vector<16x32xf32>
    %cst_42 = arith.constant dense<0.000000e+00> : vector<32xf32>
    %40 = vector.multi_reduction <add>, %39, %cst_42 [0] : vector<16x32xf32> to vector<32xf32>
    %41 = vector.shape_cast %40 : vector<32xf32> to vector<1x32xf32>
    %cst_43 = arith.constant 1.562500e-02 : f32
    %42 = vector.broadcast %cst_43 : f32 to vector<1x32xf32>
    %43 = arith.mulf %41, %42 : vector<1x32xf32>
    %cst_44 = arith.constant 9.99999974E-6 : f32
    %44 = vector.broadcast %cst_44 : f32 to vector<1x32xf32>
    %45 = arith.addf %43, %44 : vector<1x32xf32>
    %46 = math.rsqrt %45 : vector<1x32xf32>
    %47 = vector.broadcast %46 : vector<1x32xf32> to vector<16x32xf32>
    %48 = arith.mulf %37, %47 : vector<16x32xf32>
    %49 = arith.mulf %48, %13 : vector<16x32xf32>
    %50 = arith.addf %49, %15 : vector<16x32xf32>
    %cst_45 = arith.constant dense<0.000000e+00> : vector<16x32xf32>
    %51 = tpu.matmul %22, %50, %cst_45 {dimension_numbers = #tpu.dot_dimension_numbers<[1], [0], [0], [1], [0, 0, 1, 1], [], []>} : vector<16x16xf32>, vector<16x32xf32>, vector<16x32xf32> -> vector<16x32xf32>
    %52 = arith.addf %51, %21 : vector<16x32xf32>
    %53 = arith.addf %52, %11 : vector<16x32xf32>
    %cst_46 = arith.constant dense<0.000000e+00> : vector<16x32xf32>
    %54 = tpu.matmul %53, %5, %cst_46 {dimension_numbers = #tpu.dot_dimension_numbers<[1], [0], [0], [1], [0, 0, 1, 1], [], []>} : vector<16x32xf32>, vector<32x32xf32>, vector<16x32xf32> -> vector<16x32xf32>
    %cst_47 = arith.constant dense<0.000000e+00> : vector<32xf32>
    %55 = vector.multi_reduction <add>, %54, %cst_47 [0] : vector<16x32xf32> to vector<32xf32>
    %56 = vector.shape_cast %55 : vector<32xf32> to vector<1x32xf32>
    %cst_48 = arith.constant 1.562500e-02 : f32
    %57 = vector.broadcast %cst_48 : f32 to vector<1x32xf32>
    %58 = arith.mulf %56, %57 : vector<1x32xf32>
    %59 = vector.broadcast %58 : vector<1x32xf32> to vector<16x32xf32>
    %60 = arith.subf %53, %59 : vector<16x32xf32>
    %61 = arith.mulf %60, %60 : vector<16x32xf32>
    %cst_49 = arith.constant dense<0.000000e+00> : vector<16x32xf32>
    %62 = tpu.matmul %61, %5, %cst_49 {dimension_numbers = #tpu.dot_dimension_numbers<[1], [0], [0], [1], [0, 0, 1, 1], [], []>} : vector<16x32xf32>, vector<32x32xf32>, vector<16x32xf32> -> vector<16x32xf32>
    %cst_50 = arith.constant dense<0.000000e+00> : vector<32xf32>
    %63 = vector.multi_reduction <add>, %62, %cst_50 [0] : vector<16x32xf32> to vector<32xf32>
    %64 = vector.shape_cast %63 : vector<32xf32> to vector<1x32xf32>
    %cst_51 = arith.constant 1.562500e-02 : f32
    %65 = vector.broadcast %cst_51 : f32 to vector<1x32xf32>
    %66 = arith.mulf %64, %65 : vector<1x32xf32>
    %cst_52 = arith.constant 9.99999974E-6 : f32
    %67 = vector.broadcast %cst_52 : f32 to vector<1x32xf32>
    %68 = arith.addf %66, %67 : vector<1x32xf32>
    %69 = math.rsqrt %68 : vector<1x32xf32>
    %70 = vector.broadcast %69 : vector<1x32xf32> to vector<16x32xf32>
    %71 = arith.mulf %60, %70 : vector<16x32xf32>
    %72 = arith.mulf %71, %17 : vector<16x32xf32>
    %73 = arith.addf %72, %19 : vector<16x32xf32>
    %cst_53 = arith.constant dense<0.000000e+00> : vector<16x32xf32>
    %74 = tpu.matmul %73, %24, %cst_53 {dimension_numbers = #tpu.dot_dimension_numbers<[1], [0], [0], [1], [0, 0, 1, 1], [], []>} : vector<16x32xf32>, vector<32x32xf32>, vector<16x32xf32> -> vector<16x32xf32>
    %75 = vector.broadcast %26 : vector<1x32xf32> to vector<16x32xf32>
    %76 = arith.addf %74, %75 : vector<16x32xf32>
    %cst_54 = arith.constant 5.000000e-01 : f32
    %77 = vector.broadcast %cst_54 : f32 to vector<16x32xf32>
    %78 = arith.mulf %77, %76 : vector<16x32xf32>
    %cst_55 = arith.constant 0.707106769 : f32
    %79 = vector.broadcast %cst_55 : f32 to vector<16x32xf32>
    %80 = arith.mulf %76, %79 : vector<16x32xf32>
    %cst_56 = arith.constant 0.000000e+00 : f32
    %81 = vector.broadcast %cst_56 : f32 to vector<16x32xf32>
    %82 = arith.cmpf oge, %80, %81 : vector<16x32xf32>
    %cst_57 = arith.constant 1.000000e+00 : f32
    %cst_58 = arith.constant -1.000000e+00 : f32
    %83 = vector.broadcast %cst_57 : f32 to vector<16x32xf32>
    %84 = vector.broadcast %cst_58 : f32 to vector<16x32xf32>
    %85 = arith.select %82, %83, %84 : vector<16x32xi1>, vector<16x32xf32>
    %86 = math.absf %80 : vector<16x32xf32>
    %cst_59 = arith.constant 0.327591091 : f32
    %87 = vector.broadcast %cst_59 : f32 to vector<16x32xf32>
    %88 = arith.mulf %87, %86 : vector<16x32xf32>
    %cst_60 = arith.constant 1.000000e+00 : f32
    %89 = vector.broadcast %cst_60 : f32 to vector<16x32xf32>
    %90 = arith.addf %89, %88 : vector<16x32xf32>
    %cst_61 = arith.constant 1.000000e+00 : f32
    %91 = vector.broadcast %cst_61 : f32 to vector<16x32xf32>
    %92 = arith.divf %91, %90 : vector<16x32xf32>
    %cst_62 = arith.constant 1.06140542 : f32
    %93 = vector.broadcast %cst_62 : f32 to vector<16x32xf32>
    %94 = arith.mulf %93, %92 : vector<16x32xf32>
    %cst_63 = arith.constant -1.45315206 : f32
    %95 = vector.broadcast %cst_63 : f32 to vector<16x32xf32>
    %96 = arith.addf %94, %95 : vector<16x32xf32>
    %97 = arith.mulf %96, %92 : vector<16x32xf32>
    %cst_64 = arith.constant 1.42141378 : f32
    %98 = vector.broadcast %cst_64 : f32 to vector<16x32xf32>
    %99 = arith.addf %97, %98 : vector<16x32xf32>
    %100 = arith.mulf %99, %92 : vector<16x32xf32>
    %cst_65 = arith.constant -0.284496725 : f32
    %101 = vector.broadcast %cst_65 : f32 to vector<16x32xf32>
    %102 = arith.addf %100, %101 : vector<16x32xf32>
    %103 = arith.mulf %102, %92 : vector<16x32xf32>
    %cst_66 = arith.constant 0.254829586 : f32
    %104 = vector.broadcast %cst_66 : f32 to vector<16x32xf32>
    %105 = arith.addf %103, %104 : vector<16x32xf32>
    %106 = arith.mulf %105, %92 : vector<16x32xf32>
    %cst_67 = arith.constant 0.000000e+00 : f32
    %107 = vector.broadcast %cst_67 : f32 to vector<16x32xf32>
    %108 = arith.subf %107, %86 : vector<16x32xf32>
    %109 = arith.mulf %108, %86 : vector<16x32xf32>
    %110 = math.exp %109 : vector<16x32xf32>
    %111 = arith.mulf %106, %110 : vector<16x32xf32>
    %cst_68 = arith.constant 1.000000e+00 : f32
    %112 = vector.broadcast %cst_68 : f32 to vector<16x32xf32>
    %113 = arith.subf %112, %111 : vector<16x32xf32>
    %114 = arith.mulf %85, %113 : vector<16x32xf32>
    %cst_69 = arith.constant 1.000000e+00 : f32
    %115 = vector.broadcast %cst_69 : f32 to vector<16x32xf32>
    %116 = arith.addf %115, %114 : vector<16x32xf32>
    %117 = arith.mulf %78, %116 : vector<16x32xf32>
    %cst_70 = arith.constant dense<0.000000e+00> : vector<16x32xf32>
    %118 = tpu.matmul %117, %28, %cst_70 {dimension_numbers = #tpu.dot_dimension_numbers<[1], [0], [0], [1], [0, 0, 1, 1], [], []>} : vector<16x32xf32>, vector<32x32xf32>, vector<16x32xf32> -> vector<16x32xf32>
    %119 = vector.broadcast %30 : vector<1x32xf32> to vector<16x32xf32>
    %120 = arith.addf %118, %119 : vector<16x32xf32>
    %121 = arith.addf %73, %120 : vector<16x32xf32>
    %c0_71 = arith.constant 0 : index
    %c0_72 = arith.constant 0 : index
    %c0_73 = arith.constant 0 : index
    %122 = vector.load %arg4[%c0_71, %c0_72, %c0_73] : memref<5x64x32xf32, #tpu.memory_space<vmem>>, vector<1x64x32xf32>
    %123 = vector.shape_cast %122 : vector<1x64x32xf32> to vector<64x32xf32>
    %c1_74 = arith.constant 1 : index
    %c0_75 = arith.constant 0 : index
    %c0_76 = arith.constant 0 : index
    %124 = vector.load %arg4[%c1_74, %c0_75, %c0_76] : memref<5x64x32xf32, #tpu.memory_space<vmem>>, vector<1x64x32xf32>
    %125 = vector.shape_cast %124 : vector<1x64x32xf32> to vector<64x32xf32>
    %c2_77 = arith.constant 2 : index
    %c0_78 = arith.constant 0 : index
    %c0_79 = arith.constant 0 : index
    %126 = vector.load %arg4[%c2_77, %c0_78, %c0_79] : memref<5x64x32xf32, #tpu.memory_space<vmem>>, vector<1x64x32xf32>
    %127 = vector.shape_cast %126 : vector<1x64x32xf32> to vector<64x32xf32>
    %c3_80 = arith.constant 3 : index
    %c0_81 = arith.constant 0 : index
    %c0_82 = arith.constant 0 : index
    %128 = vector.load %arg4[%c3_80, %c0_81, %c0_82] : memref<5x64x32xf32, #tpu.memory_space<vmem>>, vector<1x64x32xf32>
    %129 = vector.shape_cast %128 : vector<1x64x32xf32> to vector<64x32xf32>
    %c4_83 = arith.constant 4 : index
    %c0_84 = arith.constant 0 : index
    %c0_85 = arith.constant 0 : index
    %130 = vector.load %arg4[%c4_83, %c0_84, %c0_85] : memref<5x64x32xf32, #tpu.memory_space<vmem>>, vector<1x64x32xf32>
    %131 = vector.shape_cast %130 : vector<1x64x32xf32> to vector<64x32xf32>
    %c0_86 = arith.constant 0 : index
    %c0_87 = arith.constant 0 : index
    %132 = vector.load %arg3[%c0_86, %c0_87] : memref<64x64xf32, #tpu.memory_space<vmem>>, vector<64x64xf32>
    %c0_88 = arith.constant 0 : index
    %c0_89 = arith.constant 0 : index
    %c0_90 = arith.constant 0 : index
    %133 = vector.load %arg7[%c0_88, %c0_89, %c0_90] : memref<5x32x32xf32, #tpu.memory_space<vmem>>, vector<1x32x32xf32>
    %134 = vector.shape_cast %133 : vector<1x32x32xf32> to vector<32x32xf32>
    %c0_91 = arith.constant 0 : index
    %c0_92 = arith.constant 0 : index
    %c0_93 = arith.constant 0 : index
    %135 = vector.load %arg9[%c0_91, %c0_92, %c0_93] : memref<5x1x32xf32, #tpu.memory_space<vmem>>, vector<1x1x32xf32>
    %136 = vector.shape_cast %135 : vector<1x1x32xf32> to vector<1x32xf32>
    %c1_94 = arith.constant 1 : index
    %c0_95 = arith.constant 0 : index
    %c0_96 = arith.constant 0 : index
    %137 = vector.load %arg7[%c1_94, %c0_95, %c0_96] : memref<5x32x32xf32, #tpu.memory_space<vmem>>, vector<1x32x32xf32>
    %138 = vector.shape_cast %137 : vector<1x32x32xf32> to vector<32x32xf32>
    %c1_97 = arith.constant 1 : index
    %c0_98 = arith.constant 0 : index
    %c0_99 = arith.constant 0 : index
    %139 = vector.load %arg9[%c1_97, %c0_98, %c0_99] : memref<5x1x32xf32, #tpu.memory_space<vmem>>, vector<1x1x32xf32>
    %140 = vector.shape_cast %139 : vector<1x1x32xf32> to vector<1x32xf32>
    %cst_100 = arith.constant dense<0.000000e+00> : vector<64x32xf32>
    %141 = tpu.matmul %1, %5, %cst_100 {dimension_numbers = #tpu.dot_dimension_numbers<[1], [0], [0], [1], [0, 0, 1, 1], [], []>} : vector<64x32xf32>, vector<32x32xf32>, vector<64x32xf32> -> vector<64x32xf32>
    %cst_101 = arith.constant dense<0.000000e+00> : vector<32xf32>
    %142 = vector.multi_reduction <add>, %141, %cst_101 [0] : vector<64x32xf32> to vector<32xf32>
    %143 = vector.shape_cast %142 : vector<32xf32> to vector<1x32xf32>
    %cst_102 = arith.constant 3.906250e-03 : f32
    %144 = vector.broadcast %cst_102 : f32 to vector<1x32xf32>
    %145 = arith.mulf %143, %144 : vector<1x32xf32>
    %146 = vector.broadcast %145 : vector<1x32xf32> to vector<64x32xf32>
    %147 = arith.subf %1, %146 : vector<64x32xf32>
    %148 = arith.mulf %147, %147 : vector<64x32xf32>
    %cst_103 = arith.constant dense<0.000000e+00> : vector<64x32xf32>
    %149 = tpu.matmul %148, %5, %cst_103 {dimension_numbers = #tpu.dot_dimension_numbers<[1], [0], [0], [1], [0, 0, 1, 1], [], []>} : vector<64x32xf32>, vector<32x32xf32>, vector<64x32xf32> -> vector<64x32xf32>
    %cst_104 = arith.constant dense<0.000000e+00> : vector<32xf32>
    %150 = vector.multi_reduction <add>, %149, %cst_104 [0] : vector<64x32xf32> to vector<32xf32>
    %151 = vector.shape_cast %150 : vector<32xf32> to vector<1x32xf32>
    %cst_105 = arith.constant 3.906250e-03 : f32
    %152 = vector.broadcast %cst_105 : f32 to vector<1x32xf32>
    %153 = arith.mulf %151, %152 : vector<1x32xf32>
    %cst_106 = arith.constant 9.99999974E-6 : f32
    %154 = vector.broadcast %cst_106 : f32 to vector<1x32xf32>
    %155 = arith.addf %153, %154 : vector<1x32xf32>
    %156 = math.rsqrt %155 : vector<1x32xf32>
    %157 = vector.broadcast %156 : vector<1x32xf32> to vector<64x32xf32>
    %158 = arith.mulf %147, %157 : vector<64x32xf32>
    %159 = arith.mulf %158, %123 : vector<64x32xf32>
    %160 = arith.addf %159, %125 : vector<64x32xf32>
    %cst_107 = arith.constant dense<0.000000e+00> : vector<64x32xf32>
    %161 = tpu.matmul %132, %160, %cst_107 {dimension_numbers = #tpu.dot_dimension_numbers<[1], [0], [0], [1], [0, 0, 1, 1], [], []>} : vector<64x64xf32>, vector<64x32xf32>, vector<64x32xf32> -> vector<64x32xf32>
    %162 = arith.addf %161, %131 : vector<64x32xf32>
    %163 = arith.addf %162, %1 : vector<64x32xf32>
    %cst_108 = arith.constant dense<0.000000e+00> : vector<64x32xf32>
    %164 = tpu.matmul %163, %5, %cst_108 {dimension_numbers = #tpu.dot_dimension_numbers<[1], [0], [0], [1], [0, 0, 1, 1], [], []>} : vector<64x32xf32>, vector<32x32xf32>, vector<64x32xf32> -> vector<64x32xf32>
    %cst_109 = arith.constant dense<0.000000e+00> : vector<32xf32>
    %165 = vector.multi_reduction <add>, %164, %cst_109 [0] : vector<64x32xf32> to vector<32xf32>
    %166 = vector.shape_cast %165 : vector<32xf32> to vector<1x32xf32>
    %cst_110 = arith.constant 3.906250e-03 : f32
    %167 = vector.broadcast %cst_110 : f32 to vector<1x32xf32>
    %168 = arith.mulf %166, %167 : vector<1x32xf32>
    %169 = vector.broadcast %168 : vector<1x32xf32> to vector<64x32xf32>
    %170 = arith.subf %163, %169 : vector<64x32xf32>
    %171 = arith.mulf %170, %170 : vector<64x32xf32>
    %cst_111 = arith.constant dense<0.000000e+00> : vector<64x32xf32>
    %172 = tpu.matmul %171, %5, %cst_111 {dimension_numbers = #tpu.dot_dimension_numbers<[1], [0], [0], [1], [0, 0, 1, 1], [], []>} : vector<64x32xf32>, vector<32x32xf32>, vector<64x32xf32> -> vector<64x32xf32>
    %cst_112 = arith.constant dense<0.000000e+00> : vector<32xf32>
    %173 = vector.multi_reduction <add>, %172, %cst_112 [0] : vector<64x32xf32> to vector<32xf32>
    %174 = vector.shape_cast %173 : vector<32xf32> to vector<1x32xf32>
    %cst_113 = arith.constant 3.906250e-03 : f32
    %175 = vector.broadcast %cst_113 : f32 to vector<1x32xf32>
    %176 = arith.mulf %174, %175 : vector<1x32xf32>
    %cst_114 = arith.constant 9.99999974E-6 : f32
    %177 = vector.broadcast %cst_114 : f32 to vector<1x32xf32>
    %178 = arith.addf %176, %177 : vector<1x32xf32>
    %179 = math.rsqrt %178 : vector<1x32xf32>
    %180 = vector.broadcast %179 : vector<1x32xf32> to vector<64x32xf32>
    %181 = arith.mulf %170, %180 : vector<64x32xf32>
    %182 = arith.mulf %181, %127 : vector<64x32xf32>
    %183 = arith.addf %182, %129 : vector<64x32xf32>
    %cst_115 = arith.constant dense<0.000000e+00> : vector<64x32xf32>
    %184 = tpu.matmul %183, %134, %cst_115 {dimension_numbers = #tpu.dot_dimension_numbers<[1], [0], [0], [1], [0, 0, 1, 1], [], []>} : vector<64x32xf32>, vector<32x32xf32>, vector<64x32xf32> -> vector<64x32xf32>
    %185 = vector.broadcast %136 : vector<1x32xf32> to vector<64x32xf32>
    %186 = arith.addf %184, %185 : vector<64x32xf32>
    %cst_116 = arith.constant 5.000000e-01 : f32
    %187 = vector.broadcast %cst_116 : f32 to vector<64x32xf32>
    %188 = arith.mulf %187, %186 : vector<64x32xf32>
    %cst_117 = arith.constant 0.707106769 : f32
    %189 = vector.broadcast %cst_117 : f32 to vector<64x32xf32>
    %190 = arith.mulf %186, %189 : vector<64x32xf32>
    %cst_118 = arith.constant 0.000000e+00 : f32
    %191 = vector.broadcast %cst_118 : f32 to vector<64x32xf32>
    %192 = arith.cmpf oge, %190, %191 : vector<64x32xf32>
    %cst_119 = arith.constant 1.000000e+00 : f32
    %cst_120 = arith.constant -1.000000e+00 : f32
    %193 = vector.broadcast %cst_119 : f32 to vector<64x32xf32>
    %194 = vector.broadcast %cst_120 : f32 to vector<64x32xf32>
    %195 = arith.select %192, %193, %194 : vector<64x32xi1>, vector<64x32xf32>
    %196 = math.absf %190 : vector<64x32xf32>
    %cst_121 = arith.constant 0.327591091 : f32
    %197 = vector.broadcast %cst_121 : f32 to vector<64x32xf32>
    %198 = arith.mulf %197, %196 : vector<64x32xf32>
    %cst_122 = arith.constant 1.000000e+00 : f32
    %199 = vector.broadcast %cst_122 : f32 to vector<64x32xf32>
    %200 = arith.addf %199, %198 : vector<64x32xf32>
    %cst_123 = arith.constant 1.000000e+00 : f32
    %201 = vector.broadcast %cst_123 : f32 to vector<64x32xf32>
    %202 = arith.divf %201, %200 : vector<64x32xf32>
    %cst_124 = arith.constant 1.06140542 : f32
    %203 = vector.broadcast %cst_124 : f32 to vector<64x32xf32>
    %204 = arith.mulf %203, %202 : vector<64x32xf32>
    %cst_125 = arith.constant -1.45315206 : f32
    %205 = vector.broadcast %cst_125 : f32 to vector<64x32xf32>
    %206 = arith.addf %204, %205 : vector<64x32xf32>
    %207 = arith.mulf %206, %202 : vector<64x32xf32>
    %cst_126 = arith.constant 1.42141378 : f32
    %208 = vector.broadcast %cst_126 : f32 to vector<64x32xf32>
    %209 = arith.addf %207, %208 : vector<64x32xf32>
    %210 = arith.mulf %209, %202 : vector<64x32xf32>
    %cst_127 = arith.constant -0.284496725 : f32
    %211 = vector.broadcast %cst_127 : f32 to vector<64x32xf32>
    %212 = arith.addf %210, %211 : vector<64x32xf32>
    %213 = arith.mulf %212, %202 : vector<64x32xf32>
    %cst_128 = arith.constant 0.254829586 : f32
    %214 = vector.broadcast %cst_128 : f32 to vector<64x32xf32>
    %215 = arith.addf %213, %214 : vector<64x32xf32>
    %216 = arith.mulf %215, %202 : vector<64x32xf32>
    %cst_129 = arith.constant 0.000000e+00 : f32
    %217 = vector.broadcast %cst_129 : f32 to vector<64x32xf32>
    %218 = arith.subf %217, %196 : vector<64x32xf32>
    %219 = arith.mulf %218, %196 : vector<64x32xf32>
    %220 = math.exp %219 : vector<64x32xf32>
    %221 = arith.mulf %216, %220 : vector<64x32xf32>
    %cst_130 = arith.constant 1.000000e+00 : f32
    %222 = vector.broadcast %cst_130 : f32 to vector<64x32xf32>
    %223 = arith.subf %222, %221 : vector<64x32xf32>
    %224 = arith.mulf %195, %223 : vector<64x32xf32>
    %cst_131 = arith.constant 1.000000e+00 : f32
    %225 = vector.broadcast %cst_131 : f32 to vector<64x32xf32>
    %226 = arith.addf %225, %224 : vector<64x32xf32>
    %227 = arith.mulf %188, %226 : vector<64x32xf32>
    %cst_132 = arith.constant dense<0.000000e+00> : vector<64x32xf32>
    %228 = tpu.matmul %227, %138, %cst_132 {dimension_numbers = #tpu.dot_dimension_numbers<[1], [0], [0], [1], [0, 0, 1, 1], [], []>} : vector<64x32xf32>, vector<32x32xf32>, vector<64x32xf32> -> vector<64x32xf32>
    %229 = vector.broadcast %140 : vector<1x32xf32> to vector<64x32xf32>
    %230 = arith.addf %228, %229 : vector<64x32xf32>
    %231 = arith.addf %183, %230 : vector<64x32xf32>
    %232 = tpu.concatenate %1, %231, %121 in 0 : vector<64x32xf32>, vector<64x32xf32>, vector<16x32xf32> -> vector<144x32xf32>
    %c0_133 = arith.constant 0 : index
    %c0_134 = arith.constant 0 : index
    %233 = vector.load %arg10[%c0_133, %c0_134] : memref<32x8xf32, #tpu.memory_space<vmem>>, vector<32x8xf32>
    %cst_135 = arith.constant dense<0.000000e+00> : vector<144x8xf32>
    %234 = tpu.matmul %232, %233, %cst_135 {dimension_numbers = #tpu.dot_dimension_numbers<[1], [0], [0], [1], [0, 0, 1, 1], [], []>} : vector<144x32xf32>, vector<32x8xf32>, vector<144x8xf32> -> vector<144x8xf32>
    %c0_136 = arith.constant 0 : index
    %c0_137 = arith.constant 0 : index
    %235 = vector.load %arg11[%c0_136, %c0_137] : memref<8x64xf32, #tpu.memory_space<vmem>>, vector<8x64xf32>
    %cst_138 = arith.constant dense<0.000000e+00> : vector<144x64xf32>
    %236 = tpu.matmul %234, %235, %cst_138 {dimension_numbers = #tpu.dot_dimension_numbers<[1], [0], [0], [1], [0, 0, 1, 1], [], []>} : vector<144x8xf32>, vector<8x64xf32>, vector<144x64xf32> -> vector<144x64xf32>
    %c0_139 = arith.constant 0 : index
    %c0_140 = arith.constant 0 : index
    %237 = vector.load %arg12[%c0_139, %c0_140] : memref<1x64xf32, #tpu.memory_space<vmem>>, vector<1x64xf32>
    %238 = vector.broadcast %237 : vector<1x64xf32> to vector<144x64xf32>
    %239 = arith.addf %236, %238 : vector<144x64xf32>
    %cst_141 = arith.constant 3.000000e+00 : f32
    %240 = vector.broadcast %cst_141 : f32 to vector<144x64xf32>
    %241 = arith.addf %239, %240 : vector<144x64xf32>
    %cst_142 = arith.constant 0.000000e+00 : f32
    %cst_143 = arith.constant 6.000000e+00 : f32
    %242 = vector.broadcast %cst_142 : f32 to vector<144x64xf32>
    %243 = arith.maximumf %242, %241 : vector<144x64xf32>
    %244 = vector.broadcast %cst_143 : f32 to vector<144x64xf32>
    %245 = arith.minimumf %244, %243 : vector<144x64xf32>
    %246 = arith.mulf %239, %245 : vector<144x64xf32>
    %cst_144 = arith.constant 0.166666672 : f32
    %247 = vector.broadcast %cst_144 : f32 to vector<144x64xf32>
    %248 = arith.mulf %246, %247 : vector<144x64xf32>
    %c0_145 = arith.constant 0 : index
    %c0_146 = arith.constant 0 : index
    %249 = vector.load %arg13[%c0_145, %c0_146] : memref<64x1xf32, #tpu.memory_space<vmem>>, vector<64x1xf32>
    %cst_147 = arith.constant dense<0.000000e+00> : vector<144x1xf32>
    %250 = tpu.matmul %248, %249, %cst_147 {dimension_numbers = #tpu.dot_dimension_numbers<[1], [0], [0], [1], [0, 0, 1, 1], [], []>} : vector<144x64xf32>, vector<64x1xf32>, vector<144x1xf32> -> vector<144x1xf32>
    %251 = vector.extract_strided_slice %234 {offsets = [0, 7], sizes = [144, 1], strides = [1, 1]} : vector<144x8xf32> to vector<144x1xf32>
    %c0_148 = arith.constant 0 : index
    %c0_149 = arith.constant 0 : index
    %c0_150 = arith.constant 0 : index
    %252 = vector.load %arg14[%c0_148, %c0_149, %c0_150] : memref<2x8x144xf32, #tpu.memory_space<vmem>>, vector<1x8x144xf32>
    %253 = vector.shape_cast %252 : vector<1x8x144xf32> to vector<8x144xf32>
    %cst_151 = arith.constant dense<0.000000e+00> : vector<8x1xf32>
    %254 = tpu.matmul %253, %251, %cst_151 {dimension_numbers = #tpu.dot_dimension_numbers<[1], [0], [0], [1], [0, 0, 1, 1], [], []>} : vector<8x144xf32>, vector<144x1xf32>, vector<8x1xf32> -> vector<8x1xf32>
    %c1_152 = arith.constant 1 : index
    %c0_153 = arith.constant 0 : index
    %c0_154 = arith.constant 0 : index
    %255 = vector.load %arg14[%c1_152, %c0_153, %c0_154] : memref<2x8x144xf32, #tpu.memory_space<vmem>>, vector<1x8x144xf32>
    %256 = vector.shape_cast %255 : vector<1x8x144xf32> to vector<8x144xf32>
    %cst_155 = arith.constant dense<0.000000e+00> : vector<8x1xf32>
    %257 = tpu.matmul %256, %250, %cst_155 {dimension_numbers = #tpu.dot_dimension_numbers<[1], [0], [0], [1], [0, 0, 1, 1], [], []>} : vector<8x144xf32>, vector<144x1xf32>, vector<8x1xf32> -> vector<8x1xf32>
    %258 = arith.addf %254, %257 : vector<8x1xf32>
    %c0_156 = arith.constant 0 : index
    %c0_157 = arith.constant 0 : index
    %259 = vector.load %arg15[%c0_156, %c0_157] : memref<8x1xf32, #tpu.memory_space<vmem>>, vector<8x1xf32>
    %260 = arith.addf %258, %259 : vector<8x1xf32>
    %c0_158 = arith.constant 0 : index
    %c0_159 = arith.constant 0 : index
    %c0_160 = arith.constant 0 : index
    %261 = vector.load %arg16[%c0_158, %c0_159, %c0_160] : memref<1x8x1xf32, #tpu.memory_space<vmem>>, vector<1x8x1xf32>
    %262 = vector.shape_cast %261 : vector<1x8x1xf32> to vector<8x1xf32>
    %263 = vector.shape_cast %260 : vector<8x1xf32> to vector<1x8x1xf32>
    tpu.vector_store %arg16[%c0_158, %c0_159, %c0_160], %263 {strides = array<i32>} : memref<1x8x1xf32, #tpu.memory_space<vmem>>, vector<1x8x1xf32>,
    return
  }
  func.func @transform_0(%arg0: i32) -> (i32, i32, i32) {
    %c0_i32 = arith.constant 0 : i32
    %c0_i32_0 = arith.constant 0 : i32
    %c0_i32_1 = arith.constant 0 : i32
    return %arg0, %c0_i32, %c0_i32_0 : i32, i32, i32
  }
  func.func @transform_1(%arg0: i32) -> (i32, i32, i32) {
    %c0_i32 = arith.constant 0 : i32
    %c0_i32_0 = arith.constant 0 : i32
    %c0_i32_1 = arith.constant 0 : i32
    return %arg0, %c0_i32, %c0_i32_0 : i32, i32, i32
  }
  func.func @transform_2(%arg0: i32) -> (i32, i32) {
    %c0_i32 = arith.constant 0 : i32
    %c0_i32_0 = arith.constant 0 : i32
    %c0_i32_1 = arith.constant 0 : i32
    return %c0_i32, %c0_i32_0 : i32, i32
  }
  func.func @transform_3(%arg0: i32) -> (i32, i32, i32) {
    %c0_i32 = arith.constant 0 : i32
    %c0_i32_0 = arith.constant 0 : i32
    %c0_i32_1 = arith.constant 0 : i32
    %c0_i32_2 = arith.constant 0 : i32
    return %c0_i32, %c0_i32_0, %c0_i32_1 : i32, i32, i32
  }
  func.func @transform_4(%arg0: i32) -> (i32, i32) {
    %c0_i32 = arith.constant 0 : i32
    %c0_i32_0 = arith.constant 0 : i32
    %c0_i32_1 = arith.constant 0 : i32
    return %c0_i32, %c0_i32_0 : i32, i32
  }
  func.func @transform_5(%arg0: i32) -> (i32, i32, i32) {
    %c0_i32 = arith.constant 0 : i32
    %c0_i32_0 = arith.constant 0 : i32
    %c0_i32_1 = arith.constant 0 : i32
    %c0_i32_2 = arith.constant 0 : i32
    return %c0_i32, %c0_i32_0, %c0_i32_1 : i32, i32, i32
  }
  func.func @transform_6(%arg0: i32) -> (i32, i32, i32) {
    %c0_i32 = arith.constant 0 : i32
    %c0_i32_0 = arith.constant 0 : i32
    %c0_i32_1 = arith.constant 0 : i32
    %c0_i32_2 = arith.constant 0 : i32
    return %c0_i32, %c0_i32_0, %c0_i32_1 : i32, i32, i32
  }
  func.func @transform_7(%arg0: i32) -> (i32, i32) {
    %c0_i32 = arith.constant 0 : i32
    %c0_i32_0 = arith.constant 0 : i32
    %c0_i32_1 = arith.constant 0 : i32
    return %c0_i32, %c0_i32_0 : i32, i32
  }
  func.func @transform_8(%arg0: i32) -> (i32, i32, i32) {
    %c0_i32 = arith.constant 0 : i32
    %c0_i32_0 = arith.constant 0 : i32
    %c0_i32_1 = arith.constant 0 : i32
    %c0_i32_2 = arith.constant 0 : i32
    return %c0_i32, %c0_i32_0, %c0_i32_1 : i32, i32, i32
  }
  func.func @transform_9(%arg0: i32) -> (i32, i32) {
    %c0_i32 = arith.constant 0 : i32
    %c0_i32_0 = arith.constant 0 : i32
    %c0_i32_1 = arith.constant 0 : i32
    return %c0_i32, %c0_i32_0 : i32, i32
  }
  func.func @transform_10(%arg0: i32) -> (i32, i32) {
    %c0_i32 = arith.constant 0 : i32
    %c0_i32_0 = arith.constant 0 : i32
    %c0_i32_1 = arith.constant 0 : i32
    return %c0_i32, %c0_i32_0 : i32, i32
  }
  func.func @transform_11(%arg0: i32) -> (i32, i32) {
    %c0_i32 = arith.constant 0 : i32
    %c0_i32_0 = arith.constant 0 : i32
    %c0_i32_1 = arith.constant 0 : i32
    return %c0_i32, %c0_i32_0 : i32, i32
  }
  func.func @transform_12(%arg0: i32) -> (i32, i32) {
    %c0_i32 = arith.constant 0 : i32
    %c0_i32_0 = arith.constant 0 : i32
    %c0_i32_1 = arith.constant 0 : i32
    return %c0_i32, %c0_i32_0 : i32, i32
  }
  func.func @transform_13(%arg0: i32) -> (i32, i32, i32) {
    %c0_i32 = arith.constant 0 : i32
    %c0_i32_0 = arith.constant 0 : i32
    %c0_i32_1 = arith.constant 0 : i32
    %c0_i32_2 = arith.constant 0 : i32
    return %c0_i32, %c0_i32_0, %c0_i32_1 : i32, i32, i32
  }
  func.func @transform_14(%arg0: i32) -> (i32, i32) {
    %c0_i32 = arith.constant 0 : i32
    %c0_i32_0 = arith.constant 0 : i32
    %c0_i32_1 = arith.constant 0 : i32
    return %c0_i32, %c0_i32_0 : i32, i32
  }
  func.func @transform_15(%arg0: i32) -> (i32, i32, i32) {
    %c0_i32 = arith.constant 0 : i32
    %c0_i32_0 = arith.constant 0 : i32
    %c0_i32_1 = arith.constant 0 : i32
    return %arg0, %c0_i32, %c0_i32_0 : i32, i32, i32
  }
}

</mosaic_0001>

<bundles_post_ra>
// kernel: stockmixer_forward.1
= control target key start
LH: loop header
LB: loop body
LE: loop exit
PB: predicated region body
PF: predicated region fallthrough
CT: control target
= control target key end

     0   :  { %s4947_s18 = smov 0   ;;  %s5958_s0 = inlined_call_operand.vmem [shape: f32[2,64,32], index: 0, kind: input, shape index: {}]   ;;  %s5959_s1 = inlined_call_operand.vmem [shape: f32[2,16,128], index: 1, kind: input, shape index: {}]   ;;  %s5960_s2 = inlined_call_operand.vmem [shape: f32[64,64], index: 2, kind: input, shape index: {}]   ;;  %s5961_s3 = inlined_call_operand.vmem [shape: f32[5,64,32], index: 3, kind: input, shape index: {}]   ;;  %s5962_s4 = inlined_call_operand.vmem [shape: f32[16,16], index: 4, kind: input, shape index: {}]   ;;  %s5963_s5 = inlined_call_operand.vmem [shape: f32[5,16,32], index: 5, kind: input, shape index: {}]   ;;  %s5964_s6 = inlined_call_operand.vmem [shape: f32[5,32,32], index: 6, kind: input, shape index: {}]   ;;  %s5965_s7 = inlined_call_operand.vmem [shape: f32[128,32], index: 7, kind: input, shape index: {}]   ;;  %s5966_s8 = inlined_call_operand.vmem [shape: f32[5,1,32], index: 8, kind: input, shape index: {}]   ;;  %s5967_s9 = inlined_call_operand.vmem [shape: f32[32,8], index: 9, kind: input, shape index: {}]   ;;  %s5968_s10 = inlined_call_operand.vmem [shape: f32[8,64], index: 10, kind: input, shape index: {}]   ;;  %s5969_s11 = inlined_call_operand.vmem [shape: f32[1,64], index: 11, kind: input, shape index: {}]   ;;  %s5970_s12 = inlined_call_operand.vmem [shape: f32[64,1], index: 12, kind: input, shape index: {}]   ;;  %s5971_s13 = inlined_call_operand.vmem [shape: f32[2,8,144], index: 13, kind: input, shape index: {}]   ;;  %s5972_s14 = inlined_call_operand.vmem [shape: f32[8,1], index: 14, kind: input, shape index: {}]   ;;  %s5973_s15 = inlined_call_operand.vmem [shape: f32[2,8,1], index: 15, kind: output, shape index: {}]  }
   0x1 LB: > { %s3732_s19 = sadd.s32 4294967295, %s4862_s18   ;;  %p3736_p0 = scmp.ge.s32.totalorder %s4862_s18, 1  ;;  %s4862_s18 = sphi %s4947_s18, %s25_s18  }
   0x2   : > { %p447_p1 = scmp.lt.s32.totalorder %s4862_s18, 3 }
   0x4   : > { %p448_p2 = pnand %p3736_p0, %p447_p1 }
   0x5   : > { %v528_v0 = vld [vmem:[%s5965_s7] sm:$0xff] (!%p448_p2)  ;;  %v529_v1 = vld [vmem:[%s5965_s7 + $0x8] sm:$0xff] (!%p448_p2)  ;;  %v530_v2 = vld [vmem:[%s5965_s7 + $0x10] sm:$0xff] (!%p448_p2)  ;;  %p499_p3 = scmp.lt.s32.totalorder (!%p448_p2), %s3732_s19, 1  ;;  %vm657_vm0 = vcmask (!%p448_p2), 261120   ;;  %vm852_vm1 = vcmask (!%p448_p2), 130048  }
   0x6   : > { %451 = sbr.rel (%p448_p2) target bundleno = 4112 (0x1010), region = 80  ;;  %v4516_v3 = vpack.c.bf16 (!%p448_p2), %v529_v1, %v528_v0  ;;  %v531_v4 = vld [vmem:[%s5965_s7 + $0x18] sm:$0xff] (!%p448_p2)  ;;  %v532_v6 = vld [vmem:[%s5965_s7 + $0x20] sm:$0xff] (!%p448_p2)  ;;  %v533_v7 = vld [vmem:[%s5965_s7 + $0x28] sm:$0xff] (!%p448_p2)  ;;  %vm1768_vm4 = vcmask (!%p448_p2), 523264   ;;  %vm2941_vm13 = vcmask (!%p448_p2), 64512  }
   0x7   : > { %v4520_v5 = vpack.c.bf16 (!%p448_p2), %v531_v4, %v530_v2  ;;  %v4524_v8 = vpack.c.bf16 (!%p448_p2), %v533_v7, %v532_v6  ;;  %v3742_v9 = vld [vmem:[%s5964_s6 + $0x80] sm:$0xff] (!%p448_p2)  ;;  %v3743_v10 = vld [vmem:[%s5964_s6 + $0x88] sm:$0xff] (!%p448_p2)  ;;  %v534_v11 = vld [vmem:[%s5965_s7 + $0x30] sm:$0xff] (!%p448_p2)  ;;  %s4865_s30 = smov (!%p448_p2), 121   ;;  %vm3665_vm14 = vcmask (!%p448_p2), 7168  }
   0x8   : > { %4517 = vmatprep.subr.bf16.mxu0 (!%p448_p2), %v4516_v3  ;;  %v535_v12 = vld [vmem:[%s5965_s7 + $0x38] sm:$0xff] (!%p448_p2)  ;;  %v4994_v14 = vpack.c.bf16 (!%p448_p2), %v3743_v10, %v3742_v9  ;;  %v536_v16 = vld [vmem:[%s5965_s7 + $0x40] sm:$0xff] (!%p448_p2)  ;;  %v537_v17 = vld [vmem:[%s5965_s7 + $0x48] sm:$0xff] (!%p448_p2) }
   0x9   : > { %4519 = vmatpush3.bf16.msra.mxu0 (!%p448_p2), %v4516_v3  ;;  %v4528_v15 = vpack.c.bf16 (!%p448_p2), %v535_v12, %v534_v11  ;;  %v4532_v18 = vpack.c.bf16 (!%p448_p2), %v537_v17, %v536_v16  ;;  %v538_v19 = vld [vmem:[%s5965_s7 + $0x50] sm:$0xff] (!%p448_p2)  ;;  %v539_v20 = vld [vmem:[%s5965_s7 + $0x58] sm:$0xff] (!%p448_p2)  ;;  %v540_v22 = vld [vmem:[%s5965_s7 + $0x60] sm:$0xff] (!%p448_p2) }
   0xa   : > { %4521 = vmatprep.subr.bf16.mxu0 (!%p448_p2), %v4520_v5  ;;  %4549 = vmatprep.subr.bf16.mxu1 (!%p448_p2), %v4994_v14  ;;  %v4536_v21 = vpack.c.bf16 (!%p448_p2), %v539_v20, %v538_v19  ;;  %v541_v23 = vld [vmem:[%s5965_s7 + $0x68] sm:$0xff] (!%p448_p2)  ;;  %v542_v25 = vld [vmem:[%s5965_s7 + $0x70] sm:$0xff] (!%p448_p2)  ;;  %v543_v26 = vld [vmem:[%s5965_s7 + $0x78] sm:$0xff] (!%p448_p2) }
   0xb   : > { %4551 = vmatpush3.bf16.msra.mxu1 (!%p448_p2), %v4994_v14  ;;  %v4540_v24 = vpack.c.bf16 (!%p448_p2), %v541_v23, %v540_v22  ;;  %v4544_v27 = vpack.c.bf16 (!%p448_p2), %v543_v26, %v542_v25  ;;  %v3744_v29 = vld [vmem:[%s5964_s6 + $0x90] sm:$0xff] (!%p448_p2)  ;;  %v3745_v30 = vld [vmem:[%s5964_s6 + $0x98] sm:$0xff] (!%p448_p2)  ;;  %v3747_v32 = vld [vmem:[%s5966_s8 + $0x4] ss:$0 sm:$0xff] (!%p448_p2) }
   0xc   : > { %v5029_v31 = vpack.c.bf16 (!%p448_p2), %v3745_v30, %v3744_v29  ;;  %v641_v53 = vld [vmem:[%s5962_s4] sm:$0xff] (!%p448_p2)  ;;  %v3749_v9 = vld [vmem:[%s5963_s5 + $0x18] sm:$0xff] (!%p448_p2)  ;;  %v642_v16 = vld [vmem:[%s5962_s4 + $0x8] sm:$0xff] (!%p448_p2) }
   0xd   : > { %s5975_s19 = smov (!%p499_p3, %s3732_s19), 1  ;;  %4523 = vmatpush3.bf16.msra.mxu0 %v4520_v5  ;;  %v627_v4 = vld [vmem:[%s5963_s5] sm:$0xff]  ;;  %v628_v5 = vld [vmem:[%s5963_s5 + $0x8] sm:$0xff] }
   0xe   : > { %s3939_s17 = sshll.u32 %s5975_s19, 4  ;;  %4525 = vmatprep.subr.bf16.mxu0 %v4524_v8  ;;  %4553 = vmatprep.subr.bf16.mxu1 %v5029_v31  ;;  %v3755_v17 = vld [vmem:[%s5963_s5 + $0x48] sm:$0xff]  ;;  %s3938_s27 = sshll.u32 %s5975_s19, 6 }
   0xf   : > { %s4979_s22 = scalar_lea.vmem %s5959_s1, %s3939_s17  ;;  %4555 = vmatpush3.bf16.msra.mxu1 %v5029_v31  ;;  %s5129_s25 = scalar_lea.vmem %s5958_s0, %s3938_s27 }
  0x10   : > { %v521_v13 = vld [vmem:[%s4979_s22] sm:$0xff]  ;;  %v522_v28 = vld [vmem:[%s4979_s22 + $0x8] sm:$0xff]  ;;  %4557 = vmatprep.subr.bf16.mxu1 %v4994_v14  ;;  %s3741_s17 = sshll.u32 %s5975_s19, 3 }
  0x11   : > { %4185 = vmatprep.mubr.f32.mxu0 %v521_v13  ;;  %4527 = vmatpush3.bf16.msra.mxu0 %v4524_v8  ;;  %v3748_v8 = vld [vmem:[%s5963_s5 + $0x10] sm:$0xff] }
  0x12   : > { %4529 = vmatprep.subr.bf16.mxu0 %v4528_v15 }
  0x15   : > { %4531 = vmatpush3.bf16.msra.mxu0 %v4528_v15 }
  0x16   : > { %4533 = vmatprep.subr.bf16.mxu0 %v4532_v18 }
  0x19   : > { %4535 = vmatpush3.bf16.msra.mxu0 %v4532_v18  ;;  %v3754_v18 = vld [vmem:[%s5963_s5 + $0x40] sm:$0xff] }
  0x1a   : > { %4537 = vmatprep.subr.bf16.mxu0 %v4536_v21 }
  0x1d   : > { %4539 = vmatpush3.bf16.msra.mxu0 %v4536_v21 }
  0x1e   : > { %4541 = vmatprep.subr.bf16.mxu0 %v4540_v24 }
  0x21   : > { %4543 = vmatpush3.bf16.msra.mxu0 %v4540_v24 }
  0x22   : > { %4545 = vmatprep.subr.bf16.mxu0 %v4544_v27 }
  0x25   : > { %4547 = vmatpush3.bf16.msra.mxu0 %v4544_v27 }
  0x28   : > { %4186 = vmatmul.mubr.f32.vlgmr.msra.gmra.mrb[0].mxu0 %v522_v28 }
  0xfb   : > { %v4187_v33 = vpop.f32.mrb[0].mxu0 }
  0xfc   : > { %v618_v34 = vpop.f32.mrb[1].mxu0  ;;  %v5039_v36 = vadd.f32 %v4187_v33, %v3747_v32 }
  0xfd   : > { %v5037_v35 = vadd.f32 %v3747_v32, %v618_v34 }
  0xff   : > { %4196 = vmatprep.mubr.msk.f32.mxu1 %vm657_vm0, %v5037_v35 }
 0x100   : > { %4197 = vmatmul.mubr.msk.f32.vlgmr.msra.gmra.mrb[0].mxu1 %vm657_vm0, %v5039_v36 }
 0x101   : > { %4559 = vmatpush3.bf16.msra.mxu1 %v4994_v14 }
 0x102   : > { %4561 = vmatprep.subr.bf16.mxu1 %v5029_v31 }
 0x105   : > { %4563 = vmatpush3.bf16.msra.mxu1 %v5029_v31 }
 0x1d3   : > { %v4198_v37 = vpop.f32.mrb[0].mxu1 }
 0x1d4   : > { %v740_v38 = vsel %vm657_vm0, %v4198_v37, 0.0  ;;  %v730_v39 = vpop.f32.mrb[1].mxu1 }
 0x1d5   : > { %v739_v40 = vsel %vm657_vm0, %v730_v39, 0.0 }
 0x1d6   : > { %v741_v41 = vadd.f32 %v740_v38, %v739_v40 }
 0x1d8   : > { %v742_v42 = vrot.slane %v741_v41, 4 }
 0x1da   : > { %v743_v43 = vadd.f32 %v742_v42, %v741_v41  ;;  %v3756_v42 = vld [vmem:[%s5964_s6 + $0x40] sm:$0xff] }
 0x1dc   : > { %v744_v44 = vrot.slane %v743_v43, 2 }
 0x1de   : > { %v745_v45 = vadd.f32 %v744_v44, %v743_v43  ;;  %v3757_v43 = vld [vmem:[%s5964_s6 + $0x48] sm:$0xff]  ;;  %v3758_v44 = vld [vmem:[%s5964_s6 + $0x50] sm:$0xff] }
 0x1e0   : > { %v746_v46 = vrot.slane %v745_v45, 1 }
 0x1e2   : > { %v747_v47 = vadd.f32 %v746_v46, %v745_v45  ;;  %v4584_v45 = vpack.c.bf16 %v3757_v43, %v3756_v42  ;;  %v3759_v46 = vld [vmem:[%s5964_s6 + $0x58] sm:$0xff] }
 0x1e4   : > { %v748_v48 = vmul.f32 0.015625, %v747_v47  ;;  %v4588_v47 = vpack.c.bf16 %v3759_v46, %v3758_v44  ;;  %4585 = vmatprep.subr.bf16.mxu0 %v4584_v45 }
 0x1e5   : > { %4587 = vmatpush3.bf16.msra.mxu0 %v4584_v45 }
 0x1e6   : > { %v750_v49 = vsub.f32 %v5039_v36, %v748_v48  ;;  %v749_v50 = vsub.f32 %v5037_v35, %v748_v48  ;;  %4589 = vmatprep.subr.bf16.mxu0 %v4588_v47 }
 0x1e8   : > { %v751_v51 = vmul.f32 %v749_v50, %v749_v50  ;;  %v752_v52 = vmul.f32 %v750_v49, %v750_v49 }
 0x1e9   : > { %4591 = vmatpush3.bf16.msra.mxu0 %v4588_v47 }
 0x1ea   : > { %4207 = vmatprep.mubr.msk.f32.mxu1 %vm657_vm0, %v751_v51  ;;  %4601 = vmatprep.subr.bf16.mxu0 %v4994_v14 }
 0x1eb   : > { %4208 = vmatmul.mubr.msk.f32.vlgmr.msra.gmra.mrb[2].mxu1 %vm657_vm0, %v752_v52 }
 0x1ec   : > { %4214 = vmatprep.mubr.msk.f32.mxu1 %vm852_vm1, %v641_v53 }
 0x2be   : > { %v4209_v54 = vpop.f32.mrb[2].mxu1 }
 0x2bf   : > { %v835_v55 = vsel %vm657_vm0, %v4209_v54, 0.0  ;;  %v825_v56 = vpop.f32.mrb[3].mxu1 }
 0x2c0   : > { %v834_v57 = vsel %vm657_vm0, %v825_v56, 0.0 }
 0x2c1   : > { %v836_v58 = vadd.f32 %v835_v55, %v834_v57 }
 0x2c3   : > { %v837_v59 = vrot.slane %v836_v58, 4 }
 0x2c5   : > { %v838_v60 = vadd.f32 %v837_v59, %v836_v58 }
 0x2c7   : > { %v839_v61 = vrot.slane %v838_v60, 2 }
 0x2c9   : > { %v840_v62 = vadd.f32 %v839_v61, %v838_v60 }
 0x2cb   : > { %v841_v63 = vrot.slane %v840_v62, 1 }
 0x2cd   : > { %v842_v0 = vadd.f32 %v841_v63, %v840_v62  ;;  %v3750_v62 = vld [vmem:[%s5963_s5 + $0x20] sm:$0xff]  ;;  %v3751_v63 = vld [vmem:[%s5963_s5 + $0x28] sm:$0xff] }
 0x2cf   : > { %v843_v1 = vmul.f32 0.015625, %v842_v0 }
 0x2d1   : > { %v844_v2 = vadd.f32 1e-05, %v843_v1 }
 0x2d3   : > { %4802 = vrsqrt.f32 %v844_v2  ;;  %v3752_v2 = vld [vmem:[%s5963_s5 + $0x30] sm:$0xff] }
 0x2dd   : > { %v4803_v3 = vpop.eup %4802 }
 0x2de   : > { %v846_v6 = vmul.f32 %v4803_v3, %v749_v50  ;;  %v847_v7 = vmul.f32 %v4803_v3, %v750_v49  ;;  %v3753_v3 = vld [vmem:[%s5963_s5 + $0x38] sm:$0xff] }
 0x2e0   : > { %v848_v10 = vmul.f32 %v846_v6, %v627_v4  ;;  %v849_v11 = vmul.f32 %v847_v7, %v628_v5 }
 0x2e2   : > { %v850_v12 = vadd.f32 %v3748_v8, %v848_v10  ;;  %v851_v13 = vadd.f32 %v3749_v9, %v849_v11  ;;  %v5136_v8 = vld [vmem:[%s5129_s25] sm:$0xff]  ;;  %v5148_v9 = vld [vmem:[%s5129_s25 + $0x8] sm:$0xff]  ;;  %v5151_v10 = vld [vmem:[%s5129_s25 + $0x10] sm:$0xff] }
 0x2e3   : > { %v5158_v11 = vld [vmem:[%s5129_s25 + $0x18] sm:$0xff] }
 0x2e4   : > { %v4564_v15 = vpack.c.bf16 %v851_v13, %v850_v12  ;;  %v5161_v12 = vld [vmem:[%s5129_s25 + $0x20] sm:$0xff]  ;;  %v5168_v13 = vld [vmem:[%s5129_s25 + $0x28] sm:$0xff] }
 0x2e6   : > { %4565 = vmatprep.subr.bf16.mxu1 %v4564_v15 }
 0x2e7   : > { %4567 = vmatpush3.bf16.msra.mxu1 %v4564_v15  ;;  %v5171_v15 = vld [vmem:[%s5129_s25 + $0x30] sm:$0xff] }
 0x2e8   : > { %4569 = vmatprep.subr.bf16.mxu1 %v4994_v14 }
 0x2ea   : > { %4215 = vmatmul.mubr.msk.f32.vlgmr.msra.gmra.mrb[4].mxu1 %vm852_vm1, %v642_v16  ;;  %v5178_v16 = vld [vmem:[%s5129_s25 + $0x38] sm:$0xff] }
 0x2eb   : > { %4571 = vmatpush3.bf16.msra.mxu1 %v4994_v14 }
 0x2ec   : > { %4573 = vmatprep.subr.bf16.mxu1 %v5029_v31 }
 0x2ef   : > { %4575 = vmatpush3.bf16.msra.mxu1 %v5029_v31 }
 0x2f0   : > { %4577 = vmatprep.subr.bf16.mxu1 %v4994_v14 }
 0x3bd   : > { %v4216_v19 = vpop.f32.mrb[4].mxu1 }
 0x3be   : > { %v931_v20 = vadd.f32 %v4216_v19, %v3755_v17  ;;  %v925_v21 = vpop.f32.mrb[5].mxu1  ;;  %v3761_v17 = vld [vmem:[%s5964_s6 + $0x60] sm:$0xff] }
 0x3bf   : > { %v926_v22 = vadd.f32 %v3754_v18, %v925_v21  ;;  %v3762_v18 = vld [vmem:[%s5964_s6 + $0x68] sm:$0xff]  ;;  %v3764_v21 = vld [vmem:[%s5964_s6 + $0x78] sm:$0xff] }
 0x3c0   : > { %v935_v24 = vadd.f32 %v931_v20, %v5039_v36  ;;  %v4592_v19 = vpack.c.bf16 %v3762_v18, %v3761_v17  ;;  %v3763_v20 = vld [vmem:[%s5964_s6 + $0x70] sm:$0xff] }
 0x3c1   : > { %v934_v23 = vadd.f32 %v926_v22, %v5037_v35  ;;  %v4596_v22 = vpack.c.bf16 %v3764_v21, %v3763_v20 }
 0x3c3   : > { %4225 = vmatprep.mubr.msk.f32.mxu1 %vm657_vm0, %v934_v23 }
 0x3c4   : > { %4226 = vmatmul.mubr.msk.f32.vlgmr.msra.gmra.mrb[6].mxu1 %vm657_vm0, %v935_v24 }
 0x3c5   : > { %4579 = vmatpush3.bf16.msra.mxu1 %v4994_v14 }
 0x3c6   : > { %4581 = vmatprep.subr.bf16.mxu1 %v5029_v31 }
 0x3c9   : > { %4583 = vmatpush3.bf16.msra.mxu1 %v5029_v31 }
 0x3ca   : > { %4593 = vmatprep.subr.bf16.mxu1 %v4592_v19 }
 0x497   : > { %v4227_v25 = vpop.f32.mrb[6].mxu1 }
 0x498   : > { %v1018_v26 = vsel %vm657_vm0, %v4227_v25, 0.0  ;;  %v1008_v27 = vpop.f32.mrb[7].mxu1 }
 0x499   : > { %v1017_v28 = vsel %vm657_vm0, %v1008_v27, 0.0 }
 0x49a   : > { %v1019_v29 = vadd.f32 %v1018_v26, %v1017_v28 }
 0x49c   : > { %v1020_v30 = vrot.slane %v1019_v29, 4 }
 0x49e   : > { %v1021_v32 = vadd.f32 %v1020_v30, %v1019_v29 }
 0x4a0   : > { %v1022_v33 = vrot.slane %v1021_v32, 2 }
 0x4a2   : > { %v1023_v34 = vadd.f32 %v1022_v33, %v1021_v32 }
 0x4a4   : > { %v1024_v35 = vrot.slane %v1023_v34, 1 }
 0x4a6   : > { %v1025_v36 = vadd.f32 %v1024_v35, %v1023_v34 }
 0x4a8   : > { %v1026_v37 = vmul.f32 0.015625, %v1025_v36 }
 0x4aa   : > { %v1028_v38 = vsub.f32 %v935_v24, %v1026_v37  ;;  %v1027_v39 = vsub.f32 %v934_v23, %v1026_v37  ;;  %v3776_v23 = vld [vmem:[%s5966_s8 + $0x2] ss:$0 sm:$0xff] }
 0x4ac   : > { %v1029_v40 = vmul.f32 %v1027_v39, %v1027_v39  ;;  %v1030_v41 = vmul.f32 %v1028_v38, %v1028_v38 }
 0x4ae   : > { %4236 = vmatprep.mubr.msk.f32.mxu1 %vm657_vm0, %v1029_v40 }
 0x4af   : > { %4237 = vmatmul.mubr.msk.f32.vlgmr.msra.gmra.mrb[8].mxu1 %vm657_vm0, %v1030_v41 }
 0x4b0   : > { %4595 = vmatpush3.bf16.msra.mxu1 %v4592_v19 }
 0x4b1   : > { %4597 = vmatprep.subr.bf16.mxu1 %v4596_v22 }
 0x4b4   : > { %4599 = vmatpush3.bf16.msra.mxu1 %v4596_v22 }
 0x4b5   : > { %4609 = vmatprep.subr.bf16.mxu1 %v4994_v14 }
 0x582   : > { %v4238_v48 = vpop.f32.mrb[8].mxu1 }
 0x583   : > { %v1113_v49 = vsel %vm657_vm0, %v4238_v48, 0.0  ;;  %v1103_v50 = vpop.f32.mrb[9].mxu1 }
 0x584   : > { %v1112_v51 = vsel %vm657_vm0, %v1103_v50, 0.0 }
 0x585   : > { %v1114_v52 = vadd.f32 %v1113_v49, %v1112_v51 }
 0x587   : > { %v1115_v53 = vrot.slane %v1114_v52, 4 }
 0x589   : > { %v1116_v54 = vadd.f32 %v1115_v53, %v1114_v52 }
 0x58b   : > { %v1117_v55 = vrot.slane %v1116_v54, 2 }
 0x58d   : > { %v1118_v56 = vadd.f32 %v1117_v55, %v1116_v54 }
 0x58f   : > { %v1119_v57 = vrot.slane %v1118_v56, 1 }
 0x591   : > { %v1120_v58 = vadd.f32 %v1119_v57, %v1118_v56 }
 0x593   : > { %v1121_v59 = vmul.f32 0.015625, %v1120_v58 }
 0x595   : > { %v1122_v60 = vadd.f32 1e-05, %v1121_v59 }
 0x597   : > { %4804 = vrsqrt.f32 %v1122_v60 }
 0x5a1   : > { %v4805_v61 = vpop.eup %4804 }
 0x5a2   : > { %v1124_v0 = vmul.f32 %v4805_v61, %v1027_v39  ;;  %v1125_v1 = vmul.f32 %v4805_v61, %v1028_v38 }
 0x5a4   : > { %v1126_v4 = vmul.f32 %v3750_v62, %v1124_v0  ;;  %v1127_v5 = vmul.f32 %v3751_v63, %v1125_v1 }
 0x5a6   : > { %v5131_v6 = vadd.f32 %v3752_v2, %v1126_v4  ;;  %v5133_v7 = vadd.f32 %v3753_v3, %v1127_v5 }
 0x5a8   : > { %4247 = vmatprep.mubr.msk.f32.mxu0 %vm657_vm0, %v5131_v6 }
 0x5a9   : > { %4248 = vmatmul.mubr.msk.f32.vlgmr.msra.gmra.mrb[2].mxu0 %vm657_vm0, %v5133_v7 }
 0x5aa   : > { %4603 = vmatpush3.bf16.msra.mxu0 %v4994_v14  ;;  %4269 = vmatprep.mubr.msk.f32.mxu0 %vm657_vm0, %v5136_v8 }
 0x5ab   : > { %4605 = vmatprep.subr.bf16.mxu0 %v5029_v31 }
 0x5ae   : > { %4607 = vmatpush3.bf16.msra.mxu0 %v5029_v31 }
 0x5b1   : > { %4270 = vmatmul.mubr.msk.f32.vlgmr.msra.gmra.mrb[4].mxu0 %vm657_vm0, %v5148_v9 }
 0x5b2   : > { %4272 = vmatprep.mubr.msk.f32.mxu0 %vm657_vm0, %v5151_v10 }
 0x5b5   : > { %4273 = vmatmul.mubr.msk.f32.gmra.mrb[6].mxu0 %vm657_vm0, %v5158_v11 }
 0x5b6   : > { %4275 = vmatprep.mubr.msk.f32.mxu0 %vm657_vm0, %v5161_v12 }
 0x5b9   : > { %4276 = vmatmul.mubr.msk.f32.gmra.mrb[8].mxu0 %vm657_vm0, %v5168_v13 }
 0x5ba   : > { %4278 = vmatprep.mubr.msk.f32.mxu0 %vm657_vm0, %v5171_v15 }
 0x5bd   : > { %4279 = vmatmul.mubr.msk.f32.gmra.mrb[10].mxu0 %vm657_vm0, %v5178_v16 }
 0x67c   : > { %v4249_v24 = vpop.f32.mrb[2].mxu0 }
 0x67d   : > { %v5198_v25 = vadd.f32 %v4249_v24, %v3776_v23  ;;  %v1208_v26 = vpop.f32.mrb[3].mxu0 }
 0x67e   : > { %v5200_v27 = vadd.f32 %v3776_v23, %v1208_v26 }
 0x67f   : > { %v5203_v28 = vmul.f32 0.70710677, %v5198_v25 }
 0x680   : > { %v5206_v29 = vmul.f32 0.70710677, %v5200_v27 }
 0x681   : > { %v1226_v30 = vand.u32 2147483647, %v5203_v28  ;;  %vm1222_vm2 = vcmp.ge.f32.partialorder %v5203_v28, 0.0 }
 0x682   : > { %v1225_v32 = vand.u32 2147483647, %v5206_v29  ;;  %vm1221_vm3 = vcmp.ge.f32.partialorder %v5206_v29, 0.0  ;;  %v1218_v29 = vmul.f32 0.5, %v5198_v25 }
 0x683   : > { %v1228_v33 = vmul.f32 0.3275911, %v1226_v30  ;;  %v1254_v48 = vsub.f32 0.0, %v1226_v30 }
 0x684   : > { %v1227_v34 = vmul.f32 0.3275911, %v1225_v32  ;;  %v4271_v35 = vpop.f32.mrb[4].mxu0  ;;  %v1253_v51 = vsub.f32 0.0, %v1225_v32 }
 0x685   : > { %v1230_v36 = vadd.f32 1.0, %v1228_v33  ;;  %v1554_v37 = vsel %vm657_vm0, %v4271_v35, 0.0  ;;  %v1514_v38 = vpop.f32.mrb[5].mxu0  ;;  %v1256_v57 = vmul.f32 %v1254_v48, %v1226_v30 }
 0x686   : > { %v1229_v39 = vadd.f32 1.0, %v1227_v34  ;;  %v1553_v40 = vsel %vm657_vm0, %v1514_v38, 0.0  ;;  %v1255_v62 = vmul.f32 %v1253_v51, %v1225_v32 }
 0x687   : > { %4806 = vrcp.f32 %v1230_v36  ;;  %v1555_v41 = vadd.f32 %v1554_v37, %v1553_v40  ;;  %v1259_v4 = vmul.f32 1.442695, %v1256_v57  ;;  %v1217_v57 = vmul.f32 0.5, %v5200_v27 }
 0x688   : > { %4808 = vrcp.f32 %v1229_v39  ;;  %v4274_v42 = vpop.f32.mrb[6].mxu0  ;;  %v1257_v19 = vmul.f32 1.442695, %v1255_v62 }
 0x689   : > { %v1524_v43 = vpop.f32.mrb[7].mxu0  ;;  %v1558_v44 = vsel %vm657_vm0, %v4274_v42, 0.0  ;;  %4810 = vpow2.f32 %v1259_v4 }
 0x68a   : > { %v1556_v45 = vsel %vm657_vm0, %v1524_v43, 0.0  ;;  %4812 = vpow2.f32 %v1257_v19 }
 0x68b   : > { %v1557_v46 = vadd.f32 %v1556_v45, %v1555_v41 }
 0x68c   : > { %v4277_v47 = vpop.f32.mrb[8].mxu0 }
 0x68d   : > { %v1534_v49 = vpop.f32.mrb[9].mxu0  ;;  %v1559_v50 = vadd.f32 %v1558_v44, %v1557_v46  ;;  %v1562_v52 = vsel %vm657_vm0, %v4277_v47, 0.0 }
 0x68e   : > { %v1560_v53 = vsel %vm657_vm0, %v1534_v49, 0.0  ;;  %v4864_v49 = vmov -1.0  }
 0x68f   : > { %v1561_v54 = vadd.f32 %v1560_v53, %v1559_v50  ;;  %v1224_v50 = vsel %vm1222_vm2, 1.0, %v4864_v49 }
 0x690   : > { %v4280_v55 = vpop.f32.mrb[10].mxu0 }
 0x691   : > { %v4807_v56 = vpop.eup %4806  ;;  %v1544_v58 = vpop.f32.mrb[11].mxu0  ;;  %v1563_v59 = vadd.f32 %v1562_v52, %v1561_v54  ;;  %v1566_v63 = vsel %vm657_vm0, %v4280_v55, 0.0  ;;  %v1223_v54 = vsel %vm1221_vm3, 1.0, %v4864_v49 }
 0x692   : > { %v4809_v60 = vpop.eup %4808  ;;  %v1236_v61 = vmul.f32 1.0614054, %v4807_v56  ;;  %v1564_v0 = vsel %vm657_vm0, %v1544_v58, 0.0 }
 0x693   : > { %v1235_v1 = vmul.f32 1.0614054, %v4809_v60  ;;  %v1565_v2 = vadd.f32 %v1564_v0, %v1563_v59  ;;  %v4811_v42 = vpop.eup %4810 }
 0x694   : > { %v1238_v3 = vadd.f32 -1.4531521, %v1236_v61  ;;  %v4813_v45 = vpop.eup %4812 }
 0x695   : > { %v1237_v5 = vadd.f32 -1.4531521, %v1235_v1  ;;  %v1567_v17 = vadd.f32 %v1566_v63, %v1565_v2 }
 0x696   : > { %v1240_v18 = vmul.f32 %v4807_v56, %v1238_v3 }
 0x697   : > { %v1239_v20 = vmul.f32 %v4809_v60, %v1237_v5  ;;  %v1568_v21 = vrot.slane %v1567_v17, 4 }
 0x698   : > { %v1242_v22 = vadd.f32 1.4214138, %v1240_v18 }
 0x699   : > { %v1241_v23 = vadd.f32 1.4214138, %v1239_v20  ;;  %v1569_v24 = vadd.f32 %v1568_v21, %v1567_v17  ;;  %v1404_v21 = vld [vmem:[%s5960_s2] sm:$0xff] }
 0x69a   : > { %v1244_v26 = vmul.f32 %v4807_v56, %v1242_v22  ;;  %4317 = vmatprep.mubr.msk.f32.mxu0 %vm1768_vm4, %v1404_v21 }
 0x69b   : > { %v1243_v30 = vmul.f32 %v4809_v60, %v1241_v23  ;;  %v1570_v32 = vrot.slane %v1569_v24, 2 }
 0x69c   : > { %v1246_v33 = vadd.f32 -0.28449672, %v1244_v26 }
 0x69d   : > { %v1245_v34 = vadd.f32 -0.28449672, %v1243_v30  ;;  %v1571_v35 = vadd.f32 %v1570_v32, %v1569_v24 }
 0x69e   : > { %v1248_v36 = vmul.f32 %v4807_v56, %v1246_v33 }
 0x69f   : > { %v1247_v37 = vmul.f32 %v4809_v60, %v1245_v34  ;;  %v1572_v38 = vrot.slane %v1571_v35, 1 }
 0x6a0   : > { %v1250_v39 = vadd.f32 0.2548296, %v1248_v36 }
 0x6a1   : > { %v1249_v40 = vadd.f32 0.2548296, %v1247_v37  ;;  %v1573_v44 = vadd.f32 %v1572_v38, %v1571_v35 }
 0x6a2   : > { %v1252_v41 = vmul.f32 %v4807_v56, %v1250_v39 }
 0x6a3   : > { %v1251_v43 = vmul.f32 %v4809_v60, %v1249_v40  ;;  %v1574_v52 = vmul.f32 0.00390625, %v1573_v44 }
 0x6a4   : > { %v1262_v46 = vmul.f32 %v4811_v42, %v1252_v41 }
 0x6a5   : > { %v1261_v47 = vmul.f32 %v4813_v45, %v1251_v43  ;;  %v5224_v28 = vsub.f32 %v5136_v8, %v1574_v52  ;;  %v5235_v27 = vsub.f32 %v5148_v9, %v1574_v52  ;;  %v5238_v25 = vsub.f32 %v5151_v10, %v1574_v52 }
 0x6a6   : > { %v1264_v48 = vsub.f32 1.0, %v1262_v46  ;;  %v5244_v63 = vsub.f32 %v5158_v11, %v1574_v52  ;;  %v5250_v1 = vsub.f32 %v5161_v12, %v1574_v52  ;;  %v5258_v3 = vsub.f32 %v5168_v13, %v1574_v52 }
 0x6a7   : > { %v1263_v51 = vsub.f32 1.0, %v1261_v47  ;;  %v1583_v61 = vmul.f32 %v5224_v28, %v5224_v28  ;;  %v1584_v62 = vmul.f32 %v5235_v27, %v5235_v27  ;;  %v1585_v0 = vmul.f32 %v5238_v25, %v5238_v25 }
 0x6a8   : > { %v1266_v53 = vmul.f32 %v1264_v48, %v1224_v50  ;;  %v1586_v2 = vmul.f32 %v5244_v63, %v5244_v63  ;;  %v1587_v4 = vmul.f32 %v5250_v1, %v5250_v1  ;;  %v5264_v5 = vsub.f32 %v5171_v15, %v1574_v52 }
 0x6a9   : > { %v1265_v55 = vmul.f32 %v1263_v51, %v1223_v54  ;;  %v1588_v17 = vmul.f32 %v5258_v3, %v5258_v3  ;;  %v5272_v18 = vsub.f32 %v5178_v16, %v1574_v52 }
 0x6aa   : > { %v1268_v56 = vadd.f32 1.0, %v1266_v53  ;;  %v1589_v19 = vmul.f32 %v5264_v5, %v5264_v5 }
 0x6ab   : > { %v1267_v58 = vadd.f32 1.0, %v1265_v55  ;;  %v1590_v20 = vmul.f32 %v5272_v18, %v5272_v18 }
 0x6ac   : > { %v1270_v60 = vmul.f32 %v1268_v56, %v1218_v29 }
 0x6ad   : > { %v1269_v59 = vmul.f32 %v1267_v58, %v1217_v57 }
 0x6af   : > { %4258 = vmatprep.mubr.msk.f32.mxu1 %vm657_vm0, %v1269_v59 }
 0x6b0   : > { %4259 = vmatmul.mubr.msk.f32.vlgmr.msra.gmra.mrb[10].mxu1 %vm657_vm0, %v1270_v60  ;;  %v1360_v60 = vld [vmem:[%s5961_s3] sm:$0xff] }
 0x6b1   : > { %4611 = vmatpush3.bf16.msra.mxu1 %v4994_v14  ;;  %4289 = vmatprep.mubr.msk.f32.mxu1 %vm657_vm0, %v1583_v61 }
 0x6b2   : > { %4613 = vmatprep.subr.bf16.mxu1 %v5029_v31 }
 0x6b5   : > { %4615 = vmatpush3.bf16.msra.mxu1 %v5029_v31 }
 0x6b6   : > { %4633 = vmatprep.subr.bf16.mxu1 %v4994_v14 }
 0x6b8   : > { %4290 = vmatmul.mubr.msk.f32.vlgmr.msra.gmra.mrb[12].mxu1 %vm657_vm0, %v1584_v62  ;;  %v1361_v62 = vld [vmem:[%s5961_s3 + $0x8] sm:$0xff] }
 0x6b9   : > { %4292 = vmatprep.mubr.msk.f32.mxu1 %vm657_vm0, %v1585_v0  ;;  %4635 = vmatpush3.bf16.msra.mxu1 %v4994_v14  ;;  %v1362_v0 = vld [vmem:[%s5961_s3 + $0x10] sm:$0xff] }
 0x6ba   : > { %4637 = vmatprep.subr.bf16.mxu1 %v5029_v31 }
 0x6bc   : > { %4293 = vmatmul.mubr.msk.f32.gmra.mrb[14].mxu1 %vm657_vm0, %v1586_v2  ;;  %v1363_v2 = vld [vmem:[%s5961_s3 + $0x18] sm:$0xff] }
 0x6bd   : > { %4295 = vmatprep.mubr.msk.f32.mxu1 %vm657_vm0, %v1587_v4  ;;  %4639 = vmatpush3.bf16.msra.mxu1 %v5029_v31  ;;  %v3782_v4 = vld [vmem:[%s5961_s3 + $0x40] sm:$0xff] }
 0x6c0   : > { %4296 = vmatmul.mubr.msk.f32.gmra.mrb[16].mxu1 %vm657_vm0, %v1588_v17 }
 0x6c1   : > { %4298 = vmatprep.mubr.msk.f32.mxu1 %vm657_vm0, %v1589_v19 }
 0x6c4   : > { %4299 = vmatmul.mubr.msk.f32.gmra.mrb[18].mxu1 %vm657_vm0, %v1590_v20 }
 0x783   : > { %v5285_v22 = vpop.f32.mrb[10].mxu1 }
 0x784   : > { %v5287_v23 = vpop.f32.mrb[11].mxu1 }
 0x78b   : > { %v4291_v24 = vpop.f32.mrb[12].mxu1 }
 0x78c   : > { %v1721_v26 = vsel %vm657_vm0, %v4291_v24, 0.0  ;;  %v1681_v30 = vpop.f32.mrb[13].mxu1  ;;  %v1364_v24 = vld [vmem:[%s5961_s3 + $0x20] sm:$0xff] }
 0x78d   : > { %v1720_v32 = vsel %vm657_vm0, %v1681_v30, 0.0  ;;  %v3783_v30 = vld [vmem:[%s5961_s3 + $0x48] sm:$0xff] }
 0x78e   : > { %v1722_v33 = vadd.f32 %v1721_v26, %v1720_v32  ;;  %v1365_v26 = vld [vmem:[%s5961_s3 + $0x28] sm:$0xff] }
 0x78f   : > { %v4294_v34 = vpop.f32.mrb[14].mxu1 }
 0x790   : > { %v1691_v35 = vpop.f32.mrb[15].mxu1  ;;  %v1725_v38 = vsel %vm657_vm0, %v4294_v34, 0.0 }
 0x791   : > { %v1723_v36 = vsel %vm657_vm0, %v1691_v35, 0.0 }
 0x792   : > { %v1724_v37 = vadd.f32 %v1723_v36, %v1722_v33 }
 0x793   : > { %v4297_v39 = vpop.f32.mrb[16].mxu1 }
 0x794   : > { %v1701_v40 = vpop.f32.mrb[17].mxu1  ;;  %v1726_v41 = vadd.f32 %v1725_v38, %v1724_v37  ;;  %v1729_v44 = vsel %vm657_vm0, %v4297_v39, 0.0 }
 0x795   : > { %v1727_v42 = vsel %vm657_vm0, %v1701_v40, 0.0 }
 0x796   : > { %v1728_v43 = vadd.f32 %v1727_v42, %v1726_v41 }
 0x797   : > { %v4300_v45 = vpop.f32.mrb[18].mxu1 }
 0x798   : > { %v1711_v46 = vpop.f32.mrb[19].mxu1  ;;  %v1730_v47 = vadd.f32 %v1729_v44, %v1728_v43  ;;  %v1733_v51 = vsel %vm657_vm0, %v4300_v45, 0.0  ;;  %v3787_v44 = vld [vmem:[%s5961_s3 + $0x68] sm:$0xff] }
 0x799   : > { %v1731_v48 = vsel %vm657_vm0, %v1711_v46, 0.0 }
 0x79a   : > { %v1732_v50 = vadd.f32 %v1731_v48, %v1730_v47 }
 0x79c   : > { %v1734_v52 = vadd.f32 %v1733_v51, %v1732_v50  ;;  %v3788_v51 = vld [vmem:[%s5961_s3 + $0x70] sm:$0xff] }
 0x79e   : > { %v1735_v53 = vrot.slane %v1734_v52, 4 }
 0x7a0   : > { %v1736_v54 = vadd.f32 %v1735_v53, %v1734_v52  ;;  %v3789_v52 = vld [vmem:[%s5961_s3 + $0x78] sm:$0xff] }
 0x7a2   : > { %v1737_v55 = vrot.slane %v1736_v54, 2 }
 0x7a4   : > { %v1738_v56 = vadd.f32 %v1737_v55, %v1736_v54 }
 0x7a6   : > { %v1739_v57 = vrot.slane %v1738_v56, 1 }
 0x7a8   : > { %v1740_v58 = vadd.f32 %v1739_v57, %v1738_v56  ;;  %v1405_v57 = vld [vmem:[%s5960_s2 + $0x8] sm:$0xff] }
 0x7aa   : > { %v1741_v29 = vmul.f32 0.00390625, %v1740_v58  ;;  %v1406_v58 = vld [vmem:[%s5960_s2 + $0x10] sm:$0xff] }
 0x7ac   : > { %v1742_v59 = vadd.f32 1e-05, %v1741_v29  ;;  %v1407_v29 = vld [vmem:[%s5960_s2 + $0x18] sm:$0xff] }
 0x7ae   : > { %4814 = vrsqrt.f32 %v1742_v59  ;;  %v1408_v59 = vld [vmem:[%s5960_s2 + $0x20] sm:$0xff] }
 0x7b8   : > { %v4815_v61 = vpop.eup %4814 }
 0x7b9   : > { %v1744_v17 = vmul.f32 %v4815_v61, %v5224_v28  ;;  %v1745_v19 = vmul.f32 %v4815_v61, %v5235_v27  ;;  %v1746_v20 = vmul.f32 %v4815_v61, %v5238_v25  ;;  %v1747_v21 = vmul.f32 %v4815_v61, %v5244_v63  ;;  %v3784_v28 = vld [vmem:[%s5961_s3 + $0x50] sm:$0xff]  ;;  %v3785_v27 = vld [vmem:[%s5961_s3 + $0x58] sm:$0xff] }
 0x7ba   : > { %v1748_v25 = vmul.f32 %v4815_v61, %v5250_v1  ;;  %v1749_v63 = vmul.f32 %v4815_v61, %v5258_v3  ;;  %v1750_v38 = vmul.f32 %v4815_v61, %v5264_v5  ;;  %v1751_v39 = vmul.f32 %v4815_v61, %v5272_v18  ;;  %v1366_v1 = vld [vmem:[%s5961_s3 + $0x30] sm:$0xff]  ;;  %v3786_v3 = vld [vmem:[%s5961_s3 + $0x60] sm:$0xff]  ;;  %v1367_v5 = vld [vmem:[%s5961_s3 + $0x38] sm:$0xff] }
 0x7bb   : > { %v1752_v32 = vmul.f32 %v1744_v17, %v1360_v60  ;;  %v1753_v33 = vmul.f32 %v1745_v19, %v1361_v62  ;;  %v1754_v34 = vmul.f32 %v1746_v20, %v1362_v0  ;;  %v1755_v35 = vmul.f32 %v1747_v21, %v1363_v2  ;;  %v1409_v60 = vld [vmem:[%s5960_s2 + $0x28] sm:$0xff]  ;;  %v1411_v61 = vld [vmem:[%s5960_s2 + $0x38] sm:$0xff]  ;;  %v3808_v20 = vld [vmem:[%s5961_s3 + $0x110] sm:$0xff] }
 0x7bc   : > { %v1756_v36 = vmul.f32 %v1748_v25, %v1364_v24  ;;  %v1757_v37 = vmul.f32 %v1749_v63, %v1365_v26  ;;  %v1758_v45 = vmul.f32 %v1750_v38, %v1366_v1  ;;  %v1759_v50 = vmul.f32 %v1751_v39, %v1367_v5  ;;  %v3807_v62 = vld [vmem:[%s5961_s3 + $0x108] sm:$0xff]  ;;  %v3809_v19 = vld [vmem:[%s5961_s3 + $0x118] sm:$0xff]  ;;  %v3810_v63 = vld [vmem:[%s5961_s3 + $0x120] sm:$0xff] }
 0x7bd   : > { %v1760_v40 = vadd.f32 %v3782_v4, %v1752_v32  ;;  %v1761_v41 = vadd.f32 %v3783_v30, %v1753_v33  ;;  %v1762_v42 = vadd.f32 %v3784_v28, %v1754_v34  ;;  %v1763_v43 = vadd.f32 %v3785_v27, %v1755_v35  ;;  %v3811_v25 = vld [vmem:[%s5961_s3 + $0x128] sm:$0xff] }
 0x7be   : > { %v1764_v47 = vadd.f32 %v3786_v3, %v1756_v36  ;;  %v1765_v48 = vadd.f32 %v3787_v44, %v1757_v37  ;;  %v1766_v54 = vadd.f32 %v3788_v51, %v1758_v45  ;;  %v1767_v55 = vadd.f32 %v3789_v52, %v1759_v50  ;;  %v3813_v36 = vld [vmem:[%s5961_s3 + $0x138] sm:$0xff]  ;;  %v3812_v37 = vld [vmem:[%s5961_s3 + $0x130] sm:$0xff] }
 0x7bf   : > { %v4616_v18 = vpack.c.bf16 %v1761_v41, %v1760_v40  ;;  %v4620_v46 = vpack.c.bf16 %v1763_v43, %v1762_v42 }
 0x7c0   : > { %v4624_v53 = vpack.c.bf16 %v1765_v48, %v1764_v47  ;;  %v4628_v56 = vpack.c.bf16 %v1767_v55, %v1766_v54 }
 0x7c1   : > { %4617 = vmatprep.subr.bf16.mxu0 %v4616_v18 }
 0x7c2   : > { %4619 = vmatpush3.bf16.msra.mxu0 %v4616_v18 }
 0x7c3   : > { %4621 = vmatprep.subr.bf16.mxu0 %v4620_v46 }
 0x7c6   : > { %4623 = vmatpush3.bf16.msra.mxu0 %v4620_v46 }
 0x7c7   : > { %4625 = vmatprep.subr.bf16.mxu0 %v4624_v53 }
 0x7ca   : > { %4627 = vmatpush3.bf16.msra.mxu0 %v4624_v53 }
 0x7cb   : > { %4629 = vmatprep.subr.bf16.mxu0 %v4628_v56 }
 0x7ce   : > { %4631 = vmatpush3.bf16.msra.mxu0 %v4628_v56 }
 0x7cf   : > { %4641 = vmatprep.subr.bf16.mxu0 %v4994_v14 }
 0x7d1   : > { %4318 = vmatmul.mubr.msk.f32.vlgmr.msra.gmra.mrb[12].mxu0 %vm1768_vm4, %v1405_v57 }
 0x7d2   : > { %4320 = vmatprep.mubr.msk.f32.mxu0 %vm1768_vm4, %v1406_v58  ;;  %4643 = vmatpush3.bf16.msra.mxu0 %v4994_v14  ;;  %v1410_v14 = vld [vmem:[%s5960_s2 + $0x30] sm:$0xff] }
 0x7d3   : > { %4645 = vmatprep.subr.bf16.mxu0 %v5029_v31 }
 0x7d5   : > { %4321 = vmatmul.mubr.msk.f32.gmra.mrb[14].mxu0 %vm1768_vm4, %v1407_v29 }
 0x7d6   : > { %4323 = vmatprep.mubr.msk.f32.mxu0 %vm1768_vm4, %v1408_v59  ;;  %4647 = vmatpush3.bf16.msra.mxu0 %v5029_v31  ;;  %v3806_v31 = vld [vmem:[%s5961_s3 + $0x100] sm:$0xff] }
 0x7d9   : > { %4324 = vmatmul.mubr.msk.f32.gmra.mrb[16].mxu0 %vm1768_vm4, %v1409_v60 }
 0x7da   : > { %4326 = vmatprep.mubr.msk.f32.mxu0 %vm1768_vm4, %v1410_v14 }
 0x7dd   : > { %4327 = vmatmul.mubr.msk.f32.gmra.mrb[18].mxu0 %vm1768_vm4, %v1411_v61 }
 0x8a4   : > { %v4319_v0 = vpop.f32.mrb[12].mxu0 }
 0x8a5   : > { %v1865_v2 = vadd.f32 %v4319_v0, %v3807_v62  ;;  %v1859_v4 = vpop.f32.mrb[13].mxu0 }
 0x8a6   : > { %v1860_v17 = vadd.f32 %v3806_v31, %v1859_v4 }
 0x8a7   : > { %v1899_v26 = vadd.f32 %v1865_v2, %v5148_v9 }
 0x8a8   : > { %v1898_v21 = vadd.f32 %v1860_v17, %v5136_v8  ;;  %v4322_v24 = vpop.f32.mrb[14].mxu0 }
 0x8a9   : > { %v1875_v30 = vadd.f32 %v4322_v24, %v3809_v19  ;;  %v1869_v28 = vpop.f32.mrb[15].mxu0 }
 0x8aa   : > { %v1870_v27 = vadd.f32 %v3808_v20, %v1869_v28  ;;  %4337 = vmatprep.mubr.msk.f32.mxu1 %vm657_vm0, %v1898_v21 }
 0x8ab   : > { %4338 = vmatmul.mubr.msk.f32.vlgmr.msra.gmra.mrb[20].mxu1 %vm657_vm0, %v1899_v26  ;;  %v1901_v9 = vadd.f32 %v1875_v30, %v5158_v11 }
 0x8ac   : > { %v1900_v8 = vadd.f32 %v1870_v27, %v5151_v10  ;;  %v4325_v32 = vpop.f32.mrb[16].mxu0 }
 0x8ad   : > { %v1885_v33 = vadd.f32 %v4325_v32, %v3811_v25  ;;  %v1879_v34 = vpop.f32.mrb[17].mxu0 }
 0x8ae   : > { %v1880_v35 = vadd.f32 %v3810_v63, %v1879_v34  ;;  %4340 = vmatprep.mubr.msk.f32.mxu1 %vm657_vm0, %v1900_v8 }
 0x8af   : > { %4341 = vmatmul.mubr.msk.f32.gmra.mrb[22].mxu1 %vm657_vm0, %v1901_v9  ;;  %v1903_v11 = vadd.f32 %v1885_v33, %v5168_v13 }
 0x8b0   : > { %v1902_v10 = vadd.f32 %v1880_v35, %v5161_v12  ;;  %v4328_v38 = vpop.f32.mrb[18].mxu0  ;;  %v1412_v35 = vld [vmem:[%s5964_s6] sm:$0xff] }
 0x8b1   : > { %v1895_v39 = vadd.f32 %v4328_v38, %v3813_v36  ;;  %v1889_v40 = vpop.f32.mrb[19].mxu0  ;;  %v1413_v36 = vld [vmem:[%s5964_s6 + $0x8] sm:$0xff]  ;;  %v1415_v38 = vld [vmem:[%s5964_s6 + $0x18] sm:$0xff] }
 0x8b2   : > { %v1890_v41 = vadd.f32 %v3812_v37, %v1889_v40  ;;  %4343 = vmatprep.mubr.msk.f32.mxu1 %vm657_vm0, %v1902_v10  ;;  %v1414_v37 = vld [vmem:[%s5964_s6 + $0x10] sm:$0xff] }
 0x8b3   : > { %4344 = vmatmul.mubr.msk.f32.gmra.mrb[24].mxu1 %vm657_vm0, %v1903_v11  ;;  %v1905_v43 = vadd.f32 %v1895_v39, %v5178_v16 }
 0x8b4   : > { %v1904_v42 = vadd.f32 %v1890_v41, %v5171_v15 }
 0x8b6   : > { %4346 = vmatprep.mubr.msk.f32.mxu1 %vm657_vm0, %v1904_v42 }
 0x8b7   : > { %4347 = vmatmul.mubr.msk.f32.gmra.mrb[26].mxu1 %vm657_vm0, %v1905_v43 }
 0x97e   : > { %v4339_v1 = vpop.f32.mrb[20].mxu1 }
 0x97f   : > { %v2036_v12 = vsel %vm657_vm0, %v4339_v1, 0.0  ;;  %v1996_v3 = vpop.f32.mrb[21].mxu1 }
 0x980   : > { %v2035_v13 = vsel %vm657_vm0, %v1996_v3, 0.0 }
 0x981   : > { %v2037_v44 = vadd.f32 %v2036_v12, %v2035_v13 }
 0x982   : > { %v4342_v5 = vpop.f32.mrb[22].mxu1 }
 0x983   : > { %v2006_v18 = vpop.f32.mrb[23].mxu1  ;;  %v2040_v47 = vsel %vm657_vm0, %v4342_v5, 0.0 }
 0x984   : > { %v2038_v45 = vsel %vm657_vm0, %v2006_v18, 0.0 }
 0x985   : > { %v2039_v46 = vadd.f32 %v2038_v45, %v2037_v44 }
 0x986   : > { %v4345_v48 = vpop.f32.mrb[24].mxu1 }
 0x987   : > { %v2016_v50 = vpop.f32.mrb[25].mxu1  ;;  %v2041_v51 = vadd.f32 %v2040_v47, %v2039_v46  ;;  %v2044_v54 = vsel %vm657_vm0, %v4345_v48, 0.0 }
 0x988   : > { %v2042_v52 = vsel %vm657_vm0, %v2016_v50, 0.0 }
 0x989   : > { %v2043_v53 = vadd.f32 %v2042_v52, %v2041_v51 }
 0x98a   : > { %v4348_v55 = vpop.f32.mrb[26].mxu1 }
 0x98b   : > { %v2026_v56 = vpop.f32.mrb[27].mxu1  ;;  %v2045_v57 = vadd.f32 %v2044_v54, %v2043_v53  ;;  %v2048_v59 = vsel %vm657_vm0, %v4348_v55, 0.0 }
 0x98c   : > { %v2046_v58 = vsel %vm657_vm0, %v2026_v56, 0.0 }
 0x98d   : > { %v2047_v29 = vadd.f32 %v2046_v58, %v2045_v57 }
 0x98f   : > { %v2049_v60 = vadd.f32 %v2048_v59, %v2047_v29 }
 0x991   : > { %v2050_v14 = vrot.slane %v2049_v60, 4 }
 0x993   : > { %v2051_v61 = vadd.f32 %v2050_v14, %v2049_v60 }
 0x995   : > { %v2052_v62 = vrot.slane %v2051_v61, 2 }
 0x997   : > { %v2053_v31 = vadd.f32 %v2052_v62, %v2051_v61 }
 0x999   : > { %v2054_v0 = vrot.slane %v2053_v31, 1 }
 0x99b   : > { %v2055_v2 = vadd.f32 %v2054_v0, %v2053_v31  ;;  %v3790_v0 = vld [vmem:[%s5961_s3 + $0x80] sm:$0xff] }
 0x99d   : > { %v2056_v4 = vmul.f32 0.00390625, %v2055_v2  ;;  %v3791_v2 = vld [vmem:[%s5961_s3 + $0x88] sm:$0xff] }
 0x99f   : > { %v5433_v17 = vsub.f32 %v1898_v21, %v2056_v4  ;;  %v5435_v19 = vsub.f32 %v1899_v26, %v2056_v4  ;;  %v5437_v20 = vsub.f32 %v1900_v8, %v2056_v4  ;;  %v5443_v28 = vsub.f32 %v1901_v9, %v2056_v4 }
 0x9a0   : > { %v5448_v25 = vsub.f32 %v1902_v10, %v2056_v4  ;;  %v5454_v26 = vsub.f32 %v1903_v11, %v2056_v4  ;;  %v5458_v8 = vsub.f32 %v1904_v42, %v2056_v4  ;;  %v5464_v9 = vsub.f32 %v1905_v43, %v2056_v4  ;;  %v3792_v4 = vld [vmem:[%s5961_s3 + $0x90] sm:$0xff] }
 0x9a1   : > { %v2065_v24 = vmul.f32 %v5433_v17, %v5433_v17  ;;  %v2066_v30 = vmul.f32 %v5435_v19, %v5435_v19  ;;  %v2067_v27 = vmul.f32 %v5437_v20, %v5437_v20  ;;  %v2068_v21 = vmul.f32 %v5443_v28, %v5443_v28 }
 0x9a2   : > { %v2069_v63 = vmul.f32 %v5448_v25, %v5448_v25  ;;  %v2070_v32 = vmul.f32 %v5454_v26, %v5454_v26  ;;  %v2071_v33 = vmul.f32 %v5458_v8, %v5458_v8  ;;  %v2072_v34 = vmul.f32 %v5464_v9, %v5464_v9 }
 0x9a3   : > { %4357 = vmatprep.mubr.msk.f32.mxu0 %vm657_vm0, %v2065_v24  ;;  %v4648_v10 = vpack.c.bf16 %v1413_v36, %v1412_v35  ;;  %v4652_v11 = vpack.c.bf16 %v1415_v38, %v1414_v37  ;;  %v3794_v36 = vld [vmem:[%s5961_s3 + $0xa0] sm:$0xff] }
 0x9a4   : > { %4358 = vmatmul.mubr.msk.f32.vlgmr.msra.gmra.mrb[20].mxu0 %vm657_vm0, %v2066_v30 }
 0x9a5   : > { %4360 = vmatprep.mubr.msk.f32.mxu0 %vm657_vm0, %v2067_v27  ;;  %4649 = vmatprep.subr.bf16.mxu1 %v4648_v10 }
 0x9a6   : > { %4651 = vmatpush3.bf16.msra.mxu1 %v4648_v10 }
 0x9a7   : > { %4653 = vmatprep.subr.bf16.mxu1 %v4652_v11 }
 0x9a8   : > { %4361 = vmatmul.mubr.msk.f32.gmra.mrb[22].mxu0 %vm657_vm0, %v2068_v21  ;;  %v3798_v21 = vld [vmem:[%s5961_s3 + $0xc0] sm:$0xff] }
 0x9a9   : > { %4363 = vmatprep.mubr.msk.f32.mxu0 %vm657_vm0, %v2069_v63  ;;  %v3799_v63 = vld [vmem:[%s5961_s3 + $0xc8] sm:$0xff] }
 0x9aa   : > { %4655 = vmatpush3.bf16.msra.mxu1 %v4652_v11 }
 0x9ac   : > { %4364 = vmatmul.mubr.msk.f32.gmra.mrb[24].mxu0 %vm657_vm0, %v2070_v32 }
 0x9ad   : > { %4366 = vmatprep.mubr.msk.f32.mxu0 %vm657_vm0, %v2071_v33 }
 0x9b0   : > { %4367 = vmatmul.mubr.msk.f32.gmra.mrb[26].mxu0 %vm657_vm0, %v2072_v34 }
 0xa77   : > { %v4359_v39 = vpop.f32.mrb[20].mxu0 }
 0xa78   : > { %v2203_v40 = vsel %vm657_vm0, %v4359_v39, 0.0  ;;  %v2163_v41 = vpop.f32.mrb[21].mxu0 }
 0xa79   : > { %v2202_v42 = vsel %vm657_vm0, %v2163_v41, 0.0 }
 0xa7a   : > { %v2204_v43 = vadd.f32 %v2203_v40, %v2202_v42  ;;  %v3795_v40 = vld [vmem:[%s5961_s3 + $0xa8] sm:$0xff]  ;;  %v3796_v42 = vld [vmem:[%s5961_s3 + $0xb0] sm:$0xff] }
 0xa7b   : > { %v4362_v1 = vpop.f32.mrb[22].mxu0 }
 0xa7c   : > { %v2173_v12 = vpop.f32.mrb[23].mxu0  ;;  %v2207_v44 = vsel %vm657_vm0, %v4362_v1, 0.0 }
 0xa7d   : > { %v2205_v3 = vsel %vm657_vm0, %v2173_v12, 0.0 }
 0xa7e   : > { %v2206_v13 = vadd.f32 %v2205_v3, %v2204_v43  ;;  %v3803_v3 = vld [vmem:[%s5961_s3 + $0xe8] sm:$0xff] }
 0xa7f   : > { %v4365_v5 = vpop.f32.mrb[24].mxu0 }
 0xa80   : > { %v2183_v18 = vpop.f32.mrb[25].mxu0  ;;  %v2208_v45 = vadd.f32 %v2207_v44, %v2206_v13  ;;  %v2211_v48 = vsel %vm657_vm0, %v4365_v5, 0.0  ;;  %v3797_v44 = vld [vmem:[%s5961_s3 + $0xb8] sm:$0xff]  ;;  %v3804_v5 = vld [vmem:[%s5961_s3 + $0xf0] sm:$0xff] }
 0xa81   : > { %v2209_v46 = vsel %vm657_vm0, %v2183_v18, 0.0 }
 0xa82   : > { %v2210_v47 = vadd.f32 %v2209_v46, %v2208_v45  ;;  %v3805_v46 = vld [vmem:[%s5961_s3 + $0xf8] sm:$0xff] }
 0xa83   : > { %v4368_v50 = vpop.f32.mrb[26].mxu0 }
 0xa84   : > { %v2193_v51 = vpop.f32.mrb[27].mxu0  ;;  %v2212_v52 = vadd.f32 %v2211_v48, %v2210_v47  ;;  %v2215_v55 = vsel %vm657_vm0, %v4368_v50, 0.0  ;;  %v3814_v48 = vld [vmem:[%s5964_s6 + $0x20] sm:$0xff]  ;;  %v3815_v50 = vld [vmem:[%s5964_s6 + $0x28] sm:$0xff] }
 0xa85   : > { %v2213_v53 = vsel %vm657_vm0, %v2193_v51, 0.0  ;;  %v4656_v51 = vpack.c.bf16 %v3815_v50, %v3814_v48 }
 0xa86   : > { %v2214_v54 = vadd.f32 %v2213_v53, %v2212_v52  ;;  %v3816_v52 = vld [vmem:[%s5964_s6 + $0x30] sm:$0xff]  ;;  %v3817_v53 = vld [vmem:[%s5964_s6 + $0x38] sm:$0xff] }
 0xa87   : > { %4657 = vmatprep.subr.bf16.mxu0 %v4656_v51 }
 0xa88   : > { %v2216_v56 = vadd.f32 %v2215_v55, %v2214_v54  ;;  %4659 = vmatpush3.bf16.msra.mxu0 %v4656_v51  ;;  %v2744_v54 = vld [vmem:[%s5967_s9] sm:$0xff]  ;;  %v2745_v55 = vld [vmem:[%s5967_s9 + $0x8] sm:$0xff] }
 0xa8a   : > { %v2217_v57 = vrot.slane %v2216_v56, 4 }
 0xa8c   : > { %v2218_v58 = vadd.f32 %v2217_v57, %v2216_v56  ;;  %v2746_v56 = vld [vmem:[%s5967_s9 + $0x10] sm:$0xff]  ;;  %v5604_v57 = vpack.c.bf16 %v2745_v55, %v2744_v54 }
 0xa8e   : > { %v2219_v29 = vrot.slane %v2218_v58, 2  ;;  %4742 = vmatprep.subr.bf16.mxu1 %v5604_v57 }
 0xa90   : > { %v2220_v59 = vadd.f32 %v2219_v29, %v2218_v58  ;;  %v2747_v58 = vld [vmem:[%s5967_s9 + $0x18] sm:$0xff] }
 0xa91   : > { %v5610_v29 = vpack.c.bf16 %v2747_v58, %v2746_v56 }
 0xa92   : > { %v2221_v60 = vrot.slane %v2220_v59, 1 }
 0xa94   : > { %v2222_v14 = vadd.f32 %v2221_v60, %v2220_v59  ;;  %v3859_v59 = vld [vmem:[%s5966_s8] ss:$0 sm:$0xff] }
 0xa96   : > { %v2223_v61 = vmul.f32 0.00390625, %v2222_v14 }
 0xa98   : > { %v2224_v62 = vadd.f32 1e-05, %v2223_v61 }
 0xa9a   : > { %4816 = vrsqrt.f32 %v2224_v62 }
 0xaa4   : > { %v4817_v31 = vpop.eup %4816 }
 0xaa5   : > { %v2226_v24 = vmul.f32 %v4817_v31, %v5433_v17  ;;  %v2227_v30 = vmul.f32 %v4817_v31, %v5435_v19  ;;  %v2228_v27 = vmul.f32 %v4817_v31, %v5437_v20  ;;  %v2229_v32 = vmul.f32 %v4817_v31, %v5443_v28  ;;  %v3793_v17 = vld [vmem:[%s5961_s3 + $0x98] sm:$0xff]  ;;  %v3800_v20 = vld [vmem:[%s5961_s3 + $0xd0] sm:$0xff] }
 0xaa6   : > { %v2230_v19 = vmul.f32 %v4817_v31, %v5448_v25  ;;  %v2231_v38 = vmul.f32 %v4817_v31, %v5454_v26  ;;  %v3801_v25 = vld [vmem:[%s5961_s3 + $0xd8] sm:$0xff]  ;;  %v2232_v41 = vmul.f32 %v4817_v31, %v5458_v8  ;;  %v3802_v26 = vld [vmem:[%s5961_s3 + $0xe0] sm:$0xff]  ;;  %v2233_v12 = vmul.f32 %v4817_v31, %v5464_v9 }
 0xaa7   : > { %v2234_v33 = vmul.f32 %v3790_v0, %v2226_v24  ;;  %v2235_v34 = vmul.f32 %v3791_v2, %v2227_v30  ;;  %v2236_v35 = vmul.f32 %v3792_v4, %v2228_v27  ;;  %v2237_v10 = vmul.f32 %v3793_v17, %v2229_v32 }
 0xaa8   : > { %v2238_v39 = vmul.f32 %v3794_v36, %v2230_v19  ;;  %v2239_v1 = vmul.f32 %v3795_v40, %v2231_v38  ;;  %v2240_v13 = vmul.f32 %v3796_v42, %v2232_v41  ;;  %v2241_v18 = vmul.f32 %v3797_v44, %v2233_v12 }
 0xaa9   : > { %v5522_v37 = vadd.f32 %v3798_v21, %v2234_v33  ;;  %v5524_v28 = vadd.f32 %v3799_v63, %v2235_v34  ;;  %v5529_v11 = vadd.f32 %v3800_v20, %v2236_v35  ;;  %v5548_v43 = vadd.f32 %v3801_v25, %v2237_v10 }
 0xaaa   : > { %v5551_v8 = vadd.f32 %v3802_v26, %v2238_v39  ;;  %v5566_v9 = vadd.f32 %v3803_v3, %v2239_v1  ;;  %v5568_v45 = vadd.f32 %v3804_v5, %v2240_v13  ;;  %v5577_v47 = vadd.f32 %v3805_v46, %v2241_v18 }
 0xaab   : > { %4377 = vmatprep.mubr.msk.f32.mxu1 %vm657_vm0, %v5522_v37 }
 0xaac   : > { %4378 = vmatmul.mubr.msk.f32.vlgmr.msra.gmra.mrb[28].mxu1 %vm657_vm0, %v5524_v28 }
 0xaad   : > { %4380 = vmatprep.mubr.msk.f32.mxu1 %vm657_vm0, %v5529_v11  ;;  %4744 = vmatpush3.bf16.msra.mxu1 %v5604_v57 }
 0xaae   : > { %4743 = vmatprep.subr.bf16.mxu1 %v5610_v29 }
 0xab0   : > { %4381 = vmatmul.mubr.msk.f32.gmra.mrb[30].mxu1 %vm657_vm0, %v5548_v43 }
 0xab1   : > { %4383 = vmatprep.mubr.msk.f32.mxu1 %vm657_vm0, %v5551_v8  ;;  %4745 = vmatpush3.bf16.msra.mxu1 %v5610_v29 }
 0xab4   : > { %4384 = vmatmul.mubr.msk.f32.gmra.mrb[32].mxu1 %vm657_vm0, %v5566_v9 }
 0xab5   : > { %4386 = vmatprep.mubr.msk.f32.mxu1 %vm657_vm0, %v5568_v45 }
 0xab8   : > { %4387 = vmatmul.mubr.msk.f32.gmra.mrb[34].mxu1 %vm657_vm0, %v5577_v47 }
 0xab9   : > { %4426 = vmatprep.mubr.msk.f32.mxu1 %vm657_vm0, %v5171_v15  ;;  %v4660_v15 = vpack.c.bf16 %v3817_v53, %v3816_v52 }
 0xabb   : > { %4661 = vmatprep.subr.bf16.mxu0 %v4660_v15 }
 0xabc   : > { %4663 = vmatpush3.bf16.msra.mxu0 %v4660_v15  ;;  %4427 = vmatmul.mubr.msk.f32.vlgmr.msra.gmra.mrb[36].mxu1 %vm657_vm0, %v5178_v16 }
 0xabd   : > { %4665 = vmatprep.subr.bf16.mxu0 %v5604_v57 }
 0xb7f   : > { %v4379_v60 = vpop.f32.mrb[28].mxu1 }
 0xb80   : > { %v2352_v14 = vadd.f32 %v4379_v60, %v3859_v59  ;;  %v2346_v61 = vpop.f32.mrb[29].mxu1 }
 0xb81   : > { %v2347_v62 = vadd.f32 %v3859_v59, %v2346_v61 }
 0xb82   : > { %v2394_v31 = vmul.f32 0.70710677, %v2352_v14  ;;  %v5644_v46 = vmul.f32 0.5, %v2352_v14 }
 0xb83   : > { %v2393_v0 = vmul.f32 0.70710677, %v2347_v62  ;;  %v4382_v2 = vpop.f32.mrb[30].mxu1  ;;  %v5650_v51 = vmul.f32 0.5, %v2347_v62 }
 0xb84   : > { %v2418_v4 = vand.u32 2147483647, %v2394_v31  ;;  %v5621_v24 = vadd.f32 %v4382_v2, %v3859_v59  ;;  %v2356_v30 = vpop.f32.mrb[31].mxu1  ;;  %vm2402_vm5 = vcmp.ge.f32.partialorder %v2394_v31, 0.0 }
 0xb85   : > { %v2417_v27 = vand.u32 2147483647, %v2393_v0  ;;  %v5623_v21 = vadd.f32 %v3859_v59, %v2356_v30  ;;  %vm2401_vm6 = vcmp.ge.f32.partialorder %v2393_v0, 0.0  ;;  %v5648_v50 = vsel %vm2402_vm5, 1.0, %v4864_v49 }
 0xb86   : > { %v2426_v63 = vmul.f32 0.3275911, %v2418_v4  ;;  %v5626_v32 = vmul.f32 0.70710677, %v5621_v24  ;;  %v2530_v38 = vsub.f32 0.0, %v2418_v4  ;;  %v5657_v60 = vsel %vm2401_vm6, 1.0, %v4864_v49 }
 0xb87   : > { %v2425_v16 = vmul.f32 0.3275911, %v2417_v27  ;;  %v5629_v34 = vmul.f32 0.70710677, %v5623_v21  ;;  %v4385_v35 = vpop.f32.mrb[32].mxu1  ;;  %v2529_v12 = vsub.f32 0.0, %v2417_v27 }
 0xb88   : > { %v2434_v33 = vadd.f32 1.0, %v2426_v63  ;;  %v2420_v19 = vand.u32 2147483647, %v5626_v32  ;;  %v2366_v20 = vpop.f32.mrb[33].mxu1  ;;  %v5633_v39 = vadd.f32 %v4385_v35, %v3859_v59  ;;  %v2538_v13 = vmul.f32 %v2530_v38, %v2418_v4 }
 0xb89   : > { %v2433_v17 = vadd.f32 1.0, %v2425_v16  ;;  %v2419_v25 = vand.u32 2147483647, %v5629_v34  ;;  %v5635_v26 = vadd.f32 %v3859_v59, %v2366_v20  ;;  %v2537_v53 = vmul.f32 %v2529_v12, %v2417_v27 }
 0xb8a   : > { %4818 = vrcp.f32 %v2434_v33  ;;  %v2428_v36 = vmul.f32 0.3275911, %v2420_v19  ;;  %v5638_v1 = vmul.f32 0.70710677, %v5633_v39  ;;  %v2532_v44 = vsub.f32 0.0, %v2420_v19 }
 0xb8b   : > { %4820 = vrcp.f32 %v2433_v17  ;;  %v4388_v10 = vpop.f32.mrb[34].mxu1  ;;  %v2427_v42 = vmul.f32 0.3275911, %v2419_v25  ;;  %v5641_v3 = vmul.f32 0.70710677, %v5635_v26  ;;  %v2531_v15 = vsub.f32 0.0, %v2419_v25 }
 0xb8c   : > { %v2376_v40 = vpop.f32.mrb[35].mxu1  ;;  %v2436_v41 = vadd.f32 1.0, %v2428_v36  ;;  %v2422_v18 = vand.u32 2147483647, %v5638_v1  ;;  %v5652_v55 = vadd.f32 %v4388_v10, %v3859_v59  ;;  %v2547_v58 = vmul.f32 1.442695, %v2538_v13 }
 0xb8d   : > { %v2435_v5 = vadd.f32 1.0, %v2427_v42  ;;  %v2421_v48 = vand.u32 2147483647, %v5641_v3  ;;  %v2540_v14 = vmul.f32 %v2532_v44, %v2420_v19  ;;  %v5662_v4 = vadd.f32 %v3859_v59, %v2376_v40 }
 0xb8e   : > { %4822 = vrcp.f32 %v2436_v41  ;;  %v2430_v52 = vmul.f32 0.3275911, %v2422_v18  ;;  %v2534_v0 = vsub.f32 0.0, %v2422_v18  ;;  %vm2404_vm7 = vcmp.ge.f32.partialorder %v5626_v32, 0.0 }
 0xb8f   : > { %4824 = vrcp.f32 %v2435_v5  ;;  %v2429_v54 = vmul.f32 0.3275911, %v2421_v48  ;;  %v5667_v27 = vmul.f32 0.70710677, %v5652_v55  ;;  %v2545_v16 = vmul.f32 1.442695, %v2537_v53 }
 0xb90   : > { %v2438_v61 = vadd.f32 1.0, %v2430_v52  ;;  %v2539_v33 = vmul.f32 %v2531_v15, %v2419_v25  ;;  %v2533_v17 = vsub.f32 0.0, %v2421_v48  ;;  %v2551_v36 = vmul.f32 1.442695, %v2540_v14 }
 0xb91   : > { %v2437_v2 = vadd.f32 1.0, %v2429_v54  ;;  %v2424_v19 = vand.u32 2147483647, %v5667_v27  ;;  %v2542_v10 = vmul.f32 %v2534_v0, %v2422_v18  ;;  %v5674_v38 = vmul.f32 0.70710677, %v5662_v4 }
 0xb92   : > { %4826 = vrcp.f32 %v2438_v61  ;;  %v2549_v13 = vmul.f32 1.442695, %v2539_v33  ;;  %v2541_v18 = vmul.f32 %v2533_v17, %v2421_v48  ;;  %vm2403_vm8 = vcmp.ge.f32.partialorder %v5629_v34, 0.0 }
 0xb93   : > { %4828 = vrcp.f32 %v2437_v2  ;;  %v2432_v25 = vmul.f32 0.3275911, %v2424_v19  ;;  %v2536_v42 = vsub.f32 0.0, %v2424_v19  ;;  %v5679_v44 = vand.u32 2147483647, %v5674_v38 }
 0xb94   : > { %v5654_v56 = vpop.eup %4818  ;;  %4830 = vpow2.f32 %v2547_v58  ;;  %v2555_v14 = vmul.f32 1.442695, %v2542_v10  ;;  %vm2406_vm9 = vcmp.ge.f32.partialorder %v5638_v1, 0.0  ;;  %vm2405_vm10 = vcmp.ge.f32.partialorder %v5641_v3, 0.0 }
 0xb95   : > { %v5659_v31 = vpop.eup %4820  ;;  %v2458_v62 = vmul.f32 1.0614054, %v5654_v56  ;;  %4832 = vpow2.f32 %v2545_v16  ;;  %v2440_v15 = vadd.f32 1.0, %v2432_v25  ;;  %v2431_v61 = vmul.f32 0.3275911, %v5679_v44 }
 0xb96   : > { %v2457_v30 = vmul.f32 1.0614054, %v5659_v31  ;;  %v2544_v2 = vmul.f32 %v2536_v42, %v2424_v19  ;;  %v2389_v1 = vmul.f32 0.5, %v5635_v26  ;;  %vm2408_vm11 = vcmp.ge.f32.partialorder %v5667_v27, 0.0 }
 0xb97   : > { %v2466_v63 = vadd.f32 -1.4531521, %v2458_v62  ;;  %4834 = vrcp.f32 %v2440_v15  ;;  %v2439_v16 = vadd.f32 1.0, %v2431_v61  ;;  %vm2407_vm12 = vcmp.ge.f32.partialorder %v5674_v38, 0.0 }
 0xb98   : > { %v2465_v35 = vadd.f32 -1.4531521, %v2457_v30  ;;  %v5670_v20 = vpop.eup %4822  ;;  %4836 = vpow2.f32 %v2551_v36  ;;  %v2415_v27 = vsel %vm2407_vm12, 1.0, %v4864_v49  ;;  %v2392_v38 = vmul.f32 0.5, %v5652_v55  ;;  %v4855_v55 = vld [vmem:[%s5129_s25 + $0x28] sm:$0xff] }
 0xb99   : > { %v2474_v59 = vmul.f32 %v5654_v56, %v2466_v63  ;;  %v2460_v41 = vmul.f32 1.0614054, %v5670_v20  ;;  %v5681_v5 = vpop.eup %4824  ;;  %v5691_v63 = vsel %vm2404_vm7, 1.0, %v4864_v49  ;;  %4838 = vrcp.f32 %v2439_v16 }
 0xb9a   : > { %v2473_v40 = vmul.f32 %v5659_v31, %v2465_v35  ;;  %v2459_v58 = vmul.f32 1.0614054, %v5681_v5  ;;  %4840 = vpow2.f32 %v2549_v13 }
 0xb9b   : > { %v2482_v12 = vadd.f32 1.4214138, %v2474_v59  ;;  %v2468_v53 = vadd.f32 -1.4531521, %v2460_v41  ;;  %v2553_v59 = vmul.f32 1.442695, %v2541_v18  ;;  %4842 = vpow2.f32 %v2555_v14 }
 0xb9c   : > { %v2481_v52 = vadd.f32 1.4214138, %v2473_v40  ;;  %v2467_v48 = vadd.f32 -1.4531521, %v2459_v58  ;;  %v5693_v33 = vpop.eup %4826 }
 0xb9d   : > { %v2490_v54 = vmul.f32 %v5654_v56, %v2482_v12  ;;  %v2476_v0 = vmul.f32 %v5670_v20, %v2468_v53  ;;  %v5695_v10 = vpop.eup %4828  ;;  %v2462_v41 = vmul.f32 1.0614054, %v5693_v33  ;;  %4844 = vpow2.f32 %v2553_v59 }
 0xb9e   : > { %v2489_v62 = vmul.f32 %v5659_v31, %v2481_v52  ;;  %v2475_v19 = vmul.f32 %v5681_v5, %v2467_v48  ;;  %v4831_v32 = vpop.eup %4830  ;;  %v2461_v12 = vmul.f32 1.0614054, %v5695_v10  ;;  %v2559_v52 = vmul.f32 1.442695, %v2544_v2 }
 0xb9f   : > { %v2498_v30 = vadd.f32 -0.28449672, %v2490_v54  ;;  %v2484_v17 = vadd.f32 1.4214138, %v2476_v0  ;;  %v2470_v18 = vadd.f32 -1.4531521, %v2462_v41  ;;  %v4833_v61 = vpop.eup %4832 }
 0xba0   : > { %v2497_v35 = vadd.f32 -0.28449672, %v2489_v62  ;;  %v2483_v36 = vadd.f32 1.4214138, %v2475_v19  ;;  %v2469_v58 = vadd.f32 -1.4531521, %v2461_v12  ;;  %4846 = vpow2.f32 %v2559_v52 }
 0xba1   : > { %v2506_v40 = vmul.f32 %v5654_v56, %v2498_v30  ;;  %v2492_v42 = vmul.f32 %v5670_v20, %v2484_v17  ;;  %v2478_v30 = vmul.f32 %v5693_v33, %v2470_v18 }
 0xba2   : > { %v2505_v25 = vmul.f32 %v5659_v31, %v2497_v35  ;;  %v2491_v0 = vmul.f32 %v5681_v5, %v2483_v36  ;;  %v2477_v2 = vmul.f32 %v5695_v10, %v2469_v58  ;;  %v2535_v35 = vsub.f32 0.0, %v5679_v44 }
 0xba3   : > { %v2514_v53 = vadd.f32 0.2548296, %v2506_v40  ;;  %v2500_v54 = vadd.f32 -0.28449672, %v2492_v42  ;;  %v2486_v40 = vadd.f32 1.4214138, %v2478_v30 }
 0xba4   : > { %v2513_v15 = vadd.f32 0.2548296, %v2505_v25  ;;  %v2499_v13 = vadd.f32 -0.28449672, %v2491_v0  ;;  %v2485_v25 = vadd.f32 1.4214138, %v2477_v2  ;;  %v2543_v59 = vmul.f32 %v2535_v35, %v5679_v44 }
 0xba5   : > { %v2522_v62 = vmul.f32 %v5654_v56, %v2514_v53  ;;  %v2508_v16 = vmul.f32 %v5670_v20, %v2500_v54  ;;  %v5711_v56 = vpop.eup %4834  ;;  %v2494_v42 = vmul.f32 %v5693_v33, %v2486_v40 }
 0xba6   : > { %v2521_v48 = vmul.f32 %v5659_v31, %v2513_v15  ;;  %v2507_v31 = vmul.f32 %v5681_v5, %v2499_v13  ;;  %v2464_v12 = vmul.f32 1.0614054, %v5711_v56  ;;  %v4837_v53 = vpop.eup %4836  ;;  %v2493_v18 = vmul.f32 %v5695_v10, %v2485_v25 }
 0xba7   : > { %v2562_v17 = vmul.f32 %v4831_v32, %v2522_v62  ;;  %v2516_v41 = vadd.f32 0.2548296, %v2508_v16  ;;  %v5719_v15 = vpop.eup %4838  ;;  %v2502_v58 = vadd.f32 -0.28449672, %v2494_v42 }
 0xba8   : > { %v2561_v19 = vmul.f32 %v4833_v61, %v2521_v48  ;;  %v2515_v52 = vadd.f32 0.2548296, %v2507_v31  ;;  %v2472_v61 = vadd.f32 -1.4531521, %v2464_v12  ;;  %v2501_v30 = vadd.f32 -0.28449672, %v2493_v18  ;;  %v4841_v35 = vpop.eup %4840 }
 0xba9   : > { %v2570_v14 = vsub.f32 1.0, %v2562_v17  ;;  %v2524_v36 = vmul.f32 %v5670_v20, %v2516_v41  ;;  %v2463_v48 = vmul.f32 1.0614054, %v5719_v15  ;;  %v2510_v2 = vmul.f32 %v5693_v33, %v2502_v58 }
 0xbaa   : > { %v2569_v32 = vsub.f32 1.0, %v2561_v19  ;;  %v2523_v20 = vmul.f32 %v5681_v5, %v2515_v52  ;;  %v2480_v44 = vmul.f32 %v5711_v56, %v2472_v61  ;;  %v4843_v19 = vpop.eup %4842 }
 0xbab   : > { %v2578_v54 = vmul.f32 %v2570_v14, %v5648_v50  ;;  %v2564_v0 = vmul.f32 %v4837_v53, %v2524_v36  ;;  %v2509_v50 = vmul.f32 %v5695_v10, %v2501_v30  ;;  %v2471_v40 = vadd.f32 -1.4531521, %v2463_v48  ;;  %v4845_v53 = vpop.eup %4844 }
 0xbac   : > { %v2577_v62 = vmul.f32 %v2569_v32, %v5657_v60  ;;  %v2563_v41 = vmul.f32 %v4841_v35, %v2523_v20  ;;  %v2518_v60 = vadd.f32 0.2548296, %v2510_v2  ;;  %v2488_v25 = vadd.f32 1.4214138, %v2480_v44  ;;  %v4847_v52 = vpop.eup %4846 }
 0xbad   : > { %v2586_v16 = vadd.f32 1.0, %v2578_v54  ;;  %v2572_v13 = vsub.f32 1.0, %v2564_v0  ;;  %v2557_v14 = vmul.f32 1.442695, %v2543_v59  ;;  %v2517_v5 = vadd.f32 0.2548296, %v2509_v50 }
 0xbae   : > { %v2585_v17 = vadd.f32 1.0, %v2577_v62  ;;  %v2479_v12 = vmul.f32 %v5719_v15, %v2471_v40  ;;  %v2571_v36 = vsub.f32 1.0, %v2563_v41  ;;  %v2526_v18 = vmul.f32 %v5693_v33, %v2518_v60 }
 0xbaf   : > { %v2580_v42 = vmul.f32 %v2572_v13, %v5691_v63  ;;  %v2594_v32 = vmul.f32 %v2586_v16, %v5644_v46  ;;  %v2496_v54 = vmul.f32 %v5711_v56, %v2488_v25  ;;  %v2411_v59 = vsel %vm2403_vm8, 1.0, %v4864_v49 }
 0xbb0   : > { %v2593_v31 = vmul.f32 %v2585_v17, %v5650_v51  ;;  %v2525_v51 = vmul.f32 %v5695_v10, %v2517_v5  ;;  %v2487_v63 = vadd.f32 1.4214138, %v2479_v12  ;;  %v2579_v58 = vmul.f32 %v2571_v36, %v2411_v59  ;;  %v4852_v59 = vld [vmem:[%s5129_s25 + $0x10] sm:$0xff] }
 0xbb1   : > { %v2566_v61 = vmul.f32 %v4843_v19, %v2526_v18  ;;  %v2504_v46 = vadd.f32 -0.28449672, %v2496_v54  ;;  %4848 = vpow2.f32 %v2557_v14  ;;  %v2588_v33 = vadd.f32 1.0, %v2580_v42 }
 0xbb2   : > { %4397 = vmatprep.mubr.msk.f32.mxu0 %vm657_vm0, %v2593_v31  ;;  %v2565_v62 = vmul.f32 %v4845_v53, %v2525_v51  ;;  %v2495_v34 = vmul.f32 %v5719_v15, %v2487_v63  ;;  %v2387_v0 = vmul.f32 0.5, %v5623_v21  ;;  %v2587_v10 = vadd.f32 1.0, %v2579_v58  ;;  %v4854_v51 = vld [vmem:[%s5129_s25 + $0x20] sm:$0xff]  ;;  %v5785_v58 = vpop.f32.mrb[36].mxu1 }
 0xbb3   : > { %4398 = vmatmul.mubr.msk.f32.vlgmr.msra.gmra.mrb[28].mxu0 %vm657_vm0, %v2594_v32  ;;  %v2574_v30 = vsub.f32 1.0, %v2566_v61  ;;  %v2512_v48 = vmul.f32 %v5711_v56, %v2504_v46  ;;  %v2388_v16 = vmul.f32 0.5, %v5621_v24  ;;  %v2414_v20 = vsel %vm2406_vm9, 1.0, %v4864_v49  ;;  %v2933_v63 = vld [vmem:[%s5968_s10] sm:$0xff]  ;;  %v5787_v61 = vpop.f32.mrb[37].mxu1 }
 0xbb4   : > { %4667 = vmatpush3.bf16.msra.mxu0 %v5604_v57  ;;  %v2573_v3 = vsub.f32 1.0, %v2565_v62  ;;  %v2503_v2 = vadd.f32 -0.28449672, %v2495_v34  ;;  %v2595_v44 = vmul.f32 %v2587_v10, %v2387_v0  ;;  %v2413_v57 = vsel %vm2405_vm10, 1.0, %v4864_v49 }
 0xbb5   : > { %4669 = vmatprep.subr.bf16.mxu0 %v5610_v29  ;;  %v2582_v35 = vmul.f32 %v2574_v30, %v2414_v20  ;;  %v2520_v17 = vadd.f32 0.2548296, %v2512_v48  ;;  %v2596_v21 = vmul.f32 %v2588_v33, %v2388_v16  ;;  %v2390_v60 = vmul.f32 0.5, %v5633_v39  ;;  %v3868_v33 = vld [vmem:[%s5966_s8 + $0x1] ss:$0 sm:$0xff] }
 0xbb6   : > { %v2581_v13 = vmul.f32 %v2573_v3, %v2413_v57  ;;  %v2511_v50 = vmul.f32 %v5719_v15, %v2503_v2  ;;  %4400 = vmatprep.mubr.msk.f32.mxu0 %vm657_vm0, %v2595_v44  ;;  %v2391_v32 = vmul.f32 0.5, %v5662_v4  ;;  %v4853_v4 = vld [vmem:[%s5129_s25 + $0x18] sm:$0xff]  ;;  %v4772_v46 = vpack.i.bf16 %v5785_v58, %v5787_v61 }
 0xbb7   : > { %v2590_v40 = vadd.f32 1.0, %v2582_v35  ;;  %v2528_v24 = vmul.f32 %v5711_v56, %v2520_v17  ;;  %4401 = vmatmul.mubr.msk.f32.gmra.mrb[30].mxu0 %vm657_vm0, %v2596_v21  ;;  %v2416_v56 = vsel %vm2408_vm11, 1.0, %v4864_v49  ;;  %v4851_v49 = vld [vmem:[%s5129_s25 + $0x8] sm:$0xff] }
 0xbb8   : > { %4671 = vmatpush3.bf16.msra.mxu0 %v5610_v29  ;;  %v2589_v19 = vadd.f32 1.0, %v2581_v13  ;;  %v2519_v41 = vadd.f32 0.2548296, %v2511_v50 }
 0xbb9   : > { %v2568_v25 = vmul.f32 %v4847_v52, %v2528_v24  ;;  %v2598_v42 = vmul.f32 %v2590_v40, %v2390_v60  ;;  %v4850_v52 = vld [vmem:[%s5129_s25] sm:$0xff]  ;;  %4444 = vmatprep.subr.mxu0 %v2933_v63 }
 0xbba   : > { %v2597_v14 = vmul.f32 %v2589_v19, %v2389_v1  ;;  %v2527_v31 = vmul.f32 %v5719_v15, %v2519_v41 }
 0xbbb   : > { %v4849_v29 = vpop.eup %4848  ;;  %v2576_v5 = vsub.f32 1.0, %v2568_v25 }
 0xbbc   : > { %v2567_v26 = vmul.f32 %v4849_v29, %v2527_v31  ;;  %4403 = vmatprep.mubr.msk.f32.mxu0 %vm657_vm0, %v2597_v14 }
 0xbbd   : > { %v2584_v12 = vmul.f32 %v2576_v5, %v2416_v56  ;;  %4404 = vmatmul.mubr.msk.f32.gmra.mrb[32].mxu0 %vm657_vm0, %v2598_v42  ;;  %v3242_v42 = vld [vmem:[%s5970_s12 + $0x8] sm:$0xff]  ;;  %v3243_v56 = vld [vmem:[%s5970_s12 + $0x10] sm:$0xff] }
 0xbbe   : > { %v2575_v39 = vsub.f32 1.0, %v2567_v26  ;;  %v3244_v26 = vld [vmem:[%s5970_s12 + $0x18] sm:$0xff] }
 0xbbf   : > { %v2592_v53 = vadd.f32 1.0, %v2584_v12  ;;  %v3245_v12 = vld [vmem:[%s5970_s12 + $0x20] sm:$0xff] }
 0xbc0   : > { %v2583_v15 = vmul.f32 %v2575_v39, %v2415_v27  ;;  %v4676_v39 = vpack.c.bf16 %v3244_v26, %v3243_v56  ;;  %v3246_v27 = vld [vmem:[%s5970_s12 + $0x28] sm:$0xff] }
 0xbc1   : > { %v2600_v54 = vmul.f32 %v2592_v53, %v2392_v38  ;;  %v4680_v53 = vpack.c.bf16 %v3246_v27, %v3245_v12 }
 0xbc2   : > { %v2591_v36 = vadd.f32 1.0, %v2583_v15  ;;  %v4866_v15 = vmov 0.0|0.0  }
 0xbc4   : > { %v2599_v18 = vmul.f32 %v2591_v36, %v2391_v32  ;;  %v3247_v32 = vld [vmem:[%s5970_s12 + $0x30] sm:$0xff]  ;;  %v3248_v36 = vld [vmem:[%s5970_s12 + $0x38] sm:$0xff] }
 0xbc5   : > { %v4684_v38 = vpack.c.bf16 %v3248_v36, %v3247_v32 }
 0xbc6   : > { %4406 = vmatprep.mubr.msk.f32.mxu0 %vm657_vm0, %v2599_v18 }
 0xbc7   : > { %4407 = vmatmul.mubr.msk.f32.gmra.mrb[34].mxu0 %vm657_vm0, %v2600_v54 }
 0xbc8   : > { %4417 = vmatprep.mubr.msk.f32.mxu0 %vm657_vm0, %v4850_v52 }
 0xbcb   : > { %4418 = vmatmul.mubr.msk.f32.vlgmr.msra.gmra.mrb[36].mxu0 %vm657_vm0, %v4851_v49 }
 0xbcc   : > { %4420 = vmatprep.mubr.msk.f32.mxu0 %vm657_vm0, %v4852_v59  ;;  %4445 = vmatpush3.msra.mxu0 %v2933_v63 }
 0xbcd   : > { %4688 = vmatprep.subr.bf16.mxu0 %v4866_v15 }
 0xbcf   : > { %4421 = vmatmul.mubr.msk.f32.gmra.mrb[38].mxu0 %vm657_vm0, %v4853_v4 }
 0xbd0   : > { %4423 = vmatprep.mubr.msk.f32.mxu0 %vm657_vm0, %v4854_v51 }
 0xbd3   : > { %4424 = vmatmul.mubr.msk.f32.gmra.mrb[40].mxu0 %vm657_vm0, %v4855_v55 }
 0xc86   : > { %v4399_v62 = vpop.f32.mrb[28].mxu0 }
 0xc87   : > { %v2703_v34 = vadd.f32 %v4399_v62, %v3868_v33  ;;  %v2697_v0 = vpop.f32.mrb[29].mxu0 }
 0xc88   : > { %v2698_v10 = vadd.f32 %v3868_v33, %v2697_v0 }
 0xc89   : > { %v2737_v48 = vadd.f32 %v2703_v34, %v5524_v28 }
 0xc8a   : > { %v2736_v30 = vadd.f32 %v2698_v10, %v5522_v37  ;;  %v4402_v16 = vpop.f32.mrb[30].mxu0 }
 0xc8b   : > { %v2713_v20 = vadd.f32 %v4402_v16, %v3868_v33  ;;  %v2707_v3 = vpop.f32.mrb[31].mxu0 }
 0xc8c   : > { %4429 = vmatprep.mubr.msk.f32.mxu1 %vm657_vm0, %v2736_v30  ;;  %v2708_v2 = vadd.f32 %v3868_v33, %v2707_v3 }
 0xc8d   : > { %4430 = vmatmul.mubr.msk.f32.gmra.mrb[38].mxu1 %vm657_vm0, %v2737_v48  ;;  %v2739_v35 = vadd.f32 %v2713_v20, %v5548_v43 }
 0xc8e   : > { %v2738_v44 = vadd.f32 %v2708_v2, %v5529_v11  ;;  %v3779_v11 = vld [vmem:[%s5966_s8 + $0x3] ss:$0 sm:$0xff] }
 0xc8f   : > { %v1350_v24 = vadd.f32 %v3779_v11, %v5287_v23 }
 0xc90   : > { %v4405_v57 = vpop.f32.mrb[32].mxu0  ;;  %4432 = vmatprep.mubr.msk.f32.mxu1 %vm657_vm0, %v2738_v44 }
 0xc91   : > { %v2723_v17 = vadd.f32 %v4405_v57, %v3868_v33  ;;  %v2717_v21 = vpop.f32.mrb[33].mxu0  ;;  %4433 = vmatmul.mubr.msk.f32.gmra.mrb[40].mxu1 %vm657_vm0, %v2739_v35  ;;  %v1358_v25 = vadd.f32 %v1350_v24, %v5131_v6 }
 0xc92   : > { %v2718_v37 = vadd.f32 %v3868_v33, %v2717_v21 }
 0xc93   : > { %v2741_v13 = vadd.f32 %v2723_v17, %v5566_v9  ;;  %v1355_v9 = vadd.f32 %v5285_v22, %v3779_v11 }
 0xc94   : > { %v2740_v28 = vadd.f32 %v2718_v37, %v5551_v8 }
 0xc95   : > { %v1359_v22 = vadd.f32 %v1355_v9, %v5133_v7  ;;  %v3241_v7 = vld [vmem:[%s5970_s12] sm:$0xff] }
 0xc96   : > { %4435 = vmatprep.mubr.msk.f32.mxu1 %vm657_vm0, %v2740_v28  ;;  %v4672_v5 = vpack.c.bf16 %v3242_v42, %v3241_v7 }
 0xc97   : > { %4436 = vmatmul.mubr.msk.f32.gmra.mrb[42].mxu1 %vm657_vm0, %v2741_v13 }
 0xc98   : > { %4673 = vmatprep.subr.bf16.mxu1 %v4672_v5 }
 0xc99   : > { %4675 = vmatpush3.bf16.msra.mxu1 %v4672_v5 }
 0xc9a   : > { %v4408_v43 = vpop.f32.mrb[34].mxu0  ;;  %4677 = vmatprep.subr.bf16.mxu1 %v4676_v39 }
 0xc9b   : > { %v2733_v50 = vadd.f32 %v4408_v43, %v3868_v33  ;;  %v2727_v40 = vpop.f32.mrb[35].mxu0 }
 0xc9c   : > { %v2728_v1 = vadd.f32 %v3868_v33, %v2727_v40 }
 0xc9d   : > { %v2743_v41 = vadd.f32 %v2733_v50, %v5577_v47  ;;  %4679 = vmatpush3.bf16.msra.mxu1 %v4676_v39 }
 0xc9e   : > { %v2742_v19 = vadd.f32 %v2728_v1, %v5568_v45  ;;  %v4419_v8 = vpop.f32.mrb[36].mxu0  ;;  %4681 = vmatprep.subr.bf16.mxu1 %v4680_v53 }
 0xc9f   : > { %v2844_v60 = vpop.f32.mrb[37].mxu0 }
 0xca0   : > { %4438 = vmatprep.mubr.msk.f32.mxu1 %vm657_vm0, %v2742_v19  ;;  %4446 = vmatprep.mubr.msk.f32.mxu0 %vm2941_vm13, %v2844_v60  ;;  %v4757_v14 = vpack.i.bf16 %v4419_v8, %v2844_v60 }
 0xca1   : > { %4439 = vmatmul.mubr.msk.f32.gmra.mrb[44].mxu1 %vm657_vm0, %v2743_v41  ;;  %4447 = vmatmul.mubr.msk.f32.vlgmr.msra.gmra.mrb[42].mxu0 %vm2941_vm13, %v4419_v8 }
 0xca2   : > { %4441 = vmatprep.mubr.msk.f32.mxu1 %vm657_vm0, %v1358_v25  ;;  %v4422_v23 = vpop.f32.mrb[38].mxu0  ;;  %4758 = vrot.lane.b32.xlu0 %v4757_v14, %s4865_s30 }
 0xca3   : > { %v2854_v45 = vpop.f32.mrb[39].mxu0  ;;  %4683 = vmatpush3.bf16.msra.mxu1 %v4680_v53 }
 0xca4   : > { %v4762_v47 = vpack.i.bf16 %v4422_v23, %v2854_v45  ;;  %4449 = vmatprep.mubr.msk.f32.mxu0 %vm2941_vm13, %v2854_v45  ;;  %4685 = vmatprep.subr.bf16.mxu1 %v4684_v38 }
 0xca5   : > { %4442 = vmatmul.mubr.msk.f32.gmra.mrb[46].mxu1 %vm657_vm0, %v1359_v22  ;;  %4450 = vmatmul.mubr.msk.f32.gmra.mrb[44].mxu0 %vm2941_vm13, %v4422_v23 }
 0xca6   : > { %v4425_v6 = vpop.f32.mrb[40].mxu0  ;;  %4763 = vrot.lane.b32.xlu0 %v4762_v47, %s4865_s30 }
 0xca7   : > { %v2864_v31 = vpop.f32.mrb[41].mxu0  ;;  %4687 = vmatpush3.bf16.msra.mxu1 %v4684_v38 }
 0xca8   : > { %4452 = vmatprep.mubr.msk.f32.mxu0 %vm2941_vm13, %v2864_v31  ;;  %v4767_v29 = vpack.i.bf16 %v4425_v6, %v2864_v31  ;;  %4715 = vmatprep.subr.bf16.mxu1 %v4866_v15 }
 0xca9   : > { %4453 = vmatmul.mubr.msk.f32.gmra.mrb[46].mxu0 %vm2941_vm13, %v4425_v6 }
 0xcaa   : > { %4455 = vmatprep.mubr.msk.f32.mxu0 %vm2941_vm13, %v5787_v61  ;;  %4768 = vrot.lane.b32.xlu1 %v4767_v29, %s4865_s30 }
 0xcad   : > { %4456 = vmatmul.mubr.msk.f32.gmra.mrb[48].mxu0 %vm2941_vm13, %v5785_v58  ;;  %v5874_v58 = vld [vmem:[%s5969_s11] ss:$0 sm:$0xff] }
 0xcae   : > { %4773 = vrot.lane.b32.xlu1 %v4772_v46, %s4865_s30 }
 0xd14   : > { %v4759_v30 = vpop.permute.xlu0 %4758 }
 0xd15   : > { %v4761_v35 = vunpack.i.h.bf16 %v4759_v30  ;;  %v4760_v28 = vunpack.i.l.bf16 %v4759_v30 }
 0xd17   : > { %v4716_v25 = vpack.c.bf16 %v4761_v35, %v4760_v28 }
 0xd18   : > { %v4764_v40 = vpop.permute.xlu0 %4763 }
 0xd19   : > { %v4766_v45 = vunpack.i.h.bf16 %v4764_v40  ;;  %v4765_v7 = vunpack.i.l.bf16 %v4764_v40 }
 0xd1c   : > { %v4769_v47 = vpop.permute.xlu1 %4768 }
 0xd1d   : > { %v4771_v53 = vunpack.i.h.bf16 %v4769_v47 }
 0xd60   : > { %v4431_v18 = vpop.f32.mrb[38].mxu1 }
 0xd61   : > { %v2884_v54 = vpop.f32.mrb[39].mxu1 }
 0xd62   : > { %v4777_v52 = vpack.i.bf16 %v4431_v18, %v2884_v54  ;;  %4458 = vmatprep.mubr.msk.f32.mxu0 %vm2941_vm13, %v2884_v54 }
 0xd63   : > { %4459 = vmatmul.mubr.msk.f32.gmra.mrb[50].mxu0 %vm2941_vm13, %v4431_v18  ;;  %v4770_v18 = vunpack.i.l.bf16 %v4769_v47 }
 0xd64   : > { %4778 = vrot.lane.b32.xlu0 %v4777_v52, %s4865_s30  ;;  %v4434_v49 = vpop.f32.mrb[40].mxu1 }
 0xd65   : > { %v2894_v59 = vpop.f32.mrb[41].mxu1 }
 0xd66   : > { %v4782_v4 = vpack.i.bf16 %v4434_v49, %v2894_v59  ;;  %4461 = vmatprep.mubr.msk.f32.mxu0 %vm2941_vm13, %v2894_v59  ;;  %v4719_v59 = vpack.c.bf16 %v4766_v45, %v4765_v7 }
 0xd67   : > { %4462 = vmatmul.mubr.msk.f32.gmra.mrb[52].mxu0 %vm2941_vm13, %v4434_v49 }
 0xd68   : > { %4783 = vrot.lane.b32.xlu1 %v4782_v4, %s4865_s30 }
 0xd6a   : > { %v4437_v51 = vpop.f32.mrb[42].mxu1 }
 0xd6b   : > { %v2904_v55 = vpop.f32.mrb[43].mxu1 }
 0xd6c   : > { %v4787_v63 = vpack.i.bf16 %v4437_v51, %v2904_v55  ;;  %4464 = vmatprep.mubr.msk.f32.mxu0 %vm2941_vm13, %v2904_v55 }
 0xd6d   : > { %4465 = vmatmul.mubr.msk.f32.gmra.mrb[54].mxu0 %vm2941_vm13, %v4437_v51 }
 0xd6e   : > { %4788 = vrot.lane.b32.xlu0 %v4787_v63, %s4865_s30  ;;  %v4774_v63 = vpop.permute.xlu1 %4773 }
 0xd6f   : > { %v4776_v30 = vunpack.i.h.bf16 %v4774_v63 }
 0xd74   : > { %v4440_v61 = vpop.f32.mrb[44].mxu1  ;;  %v4448_v46 = vpop.f32.mrb[42].mxu0 }
 0xd75   : > { %v2914_v33 = vpop.f32.mrb[45].mxu1  ;;  %v3068_v62 = vadd.f32 %v4448_v46, %v5874_v58  ;;  %v3062_v34 = vpop.f32.mrb[43].mxu0 }
 0xd76   : > { %v4792_v0 = vpack.i.bf16 %v4440_v61, %v2914_v33  ;;  %4467 = vmatprep.mubr.msk.f32.mxu0 %vm2941_vm13, %v2914_v33  ;;  %v3063_v10 = vadd.f32 %v5874_v58, %v3062_v34  ;;  %v4722_v34 = vpack.c.bf16 %v4771_v53, %v4770_v18 }
 0xd77   : > { %4468 = vmatmul.mubr.msk.f32.gmra.mrb[56].mxu0 %vm2941_vm13, %v4440_v61  ;;  %v3152_v48 = vadd.f32 3.0, %v3068_v62 }
 0xd78   : > { %4793 = vrot.lane.b32.xlu1 %v4792_v0, %s4865_s30  ;;  %v4443_v16 = vpop.f32.mrb[46].mxu1  ;;  %v3151_v20 = vadd.f32 3.0, %v3063_v10  ;;  %v4451_v3 = vpop.f32.mrb[44].mxu0 }
 0xd79   : > { %v2924_v2 = vpop.f32.mrb[47].mxu1  ;;  %v3170_v44 = vmax.f32 %v3152_v48, 0.0  ;;  %v3078_v57 = vadd.f32 %v4451_v3, %v5874_v58  ;;  %v3072_v17 = vpop.f32.mrb[45].mxu0  ;;  %v4775_v48 = vunpack.i.l.bf16 %v4774_v63 }
 0xd7a   : > { %v4797_v21 = vpack.i.bf16 %v4443_v16, %v2924_v2  ;;  %4470 = vmatprep.mubr.msk.f32.mxu0 %vm2941_vm13, %v2924_v2  ;;  %v3169_v37 = vmax.f32 %v3151_v20, 0.0  ;;  %v3073_v13 = vadd.f32 %v5874_v58, %v3072_v17 }
 0xd7b   : > { %4471 = vmatmul.mubr.msk.f32.gmra.mrb[58].mxu0 %vm2941_vm13, %v4443_v16  ;;  %v3188_v11 = vmin.f32 %v3170_v44, 6.0  ;;  %v3154_v43 = vadd.f32 3.0, %v3078_v57  ;;  %v4725_v35 = vpack.c.bf16 %v4776_v30, %v4775_v48 }
 0xd7c   : > { %4798 = vrot.lane.b32.xlu0 %v4797_v21, %s4865_s30  ;;  %v3187_v50 = vmin.f32 %v3169_v37, 6.0  ;;  %v3153_v24 = vadd.f32 3.0, %v3073_v13  ;;  %v4454_v1 = vpop.f32.mrb[46].mxu0  ;;  %s512_s30 = scalar_lea.vmem %s5973_s15, %s3741_s17 }
 0xd7d   : > { %v3206_v19 = vmul.f32 %v3188_v11, %v3068_v62  ;;  %v3172_v8 = vmax.f32 %v3154_v43, 0.0  ;;  %v3088_v9 = vadd.f32 %v4454_v1, %v5874_v58  ;;  %v3082_v41 = vpop.f32.mrb[47].mxu0 }
 0xd7e   : > { %v3205_v60 = vmul.f32 %v3187_v50, %v3063_v10  ;;  %v3171_v14 = vmax.f32 %v3153_v24, 0.0  ;;  %v3083_v23 = vadd.f32 %v5874_v58, %v3082_v41 }
 0xd7f   : > { %v3224_v22 = vmul.f32 0.16666667, %v3206_v19  ;;  %v3190_v6 = vmin.f32 %v3172_v8, 6.0  ;;  %v3156_v31 = vadd.f32 3.0, %v3088_v9 }
 0xd80   : > { %v3223_v29 = vmul.f32 0.16666667, %v3205_v60  ;;  %v3189_v42 = vmin.f32 %v3171_v14, 6.0  ;;  %v3155_v5 = vadd.f32 3.0, %v3083_v23  ;;  %v4457_v56 = vpop.f32.mrb[48].mxu0 }
 0xd81   : > { %v3208_v26 = vmul.f32 %v3190_v6, %v3078_v57  ;;  %v3174_v12 = vmax.f32 %v3156_v31, 0.0  ;;  %v3098_v39 = vadd.f32 %v4457_v56, %v5874_v58  ;;  %v3092_v27 = vpop.f32.mrb[49].mxu0 }
 0xd82   : > { %4489 = vmatprep.mubr.msk.f32.mxu1 %vm1768_vm4, %v3223_v29  ;;  %v3207_v32 = vmul.f32 %v3189_v42, %v3073_v13  ;;  %v3173_v36 = vmax.f32 %v3155_v5, 0.0  ;;  %v3093_v38 = vadd.f32 %v5874_v58, %v3092_v27 }
 0xd83   : > { %4490 = vmatmul.mubr.msk.f32.vlgmr.msra.gmra.mrb[48].mxu1 %vm1768_vm4, %v3224_v22  ;;  %v3226_v54 = vmul.f32 0.16666667, %v3208_v26  ;;  %v3192_v52 = vmin.f32 %v3174_v12, 6.0  ;;  %v3158_v49 = vadd.f32 3.0, %v3098_v39 }
 0xd84   : > { %4717 = vmatpush1.bf16.msra.mxu1 %v4716_v25  ;;  %v3225_v4 = vmul.f32 0.16666667, %v3207_v32  ;;  %v3191_v51 = vmin.f32 %v3173_v36, 6.0  ;;  %v3157_v55 = vadd.f32 3.0, %v3093_v38 }
 0xd85   : > { %4718 = vmatprep.subr.bf16.mxu1 %v4866_v15  ;;  %v3210_v61 = vmul.f32 %v3192_v52, %v3088_v9  ;;  %v3176_v46 = vmax.f32 %v3158_v49, 0.0 }
 0xd86   : > { %v3209_v33 = vmul.f32 %v3191_v51, %v3083_v23  ;;  %v3175_v62 = vmax.f32 %v3157_v55, 0.0  ;;  %4492 = vmatprep.mubr.msk.f32.mxu1 %vm1768_vm4, %v3225_v4 }
 0xd87   : > { %v3228_v0 = vmul.f32 0.16666667, %v3210_v61  ;;  %v3194_v10 = vmin.f32 %v3176_v46, 6.0  ;;  %4493 = vmatmul.mubr.msk.f32.gmra.mrb[50].mxu1 %vm1768_vm4, %v3226_v54 }
 0xd88   : > { %4720 = vmatpush1.bf16.msra.mxu1 %v4719_v59  ;;  %v3227_v16 = vmul.f32 0.16666667, %v3209_v33  ;;  %v3193_v20 = vmin.f32 %v3175_v62, 6.0 }
 0xd89   : > { %4721 = vmatprep.subr.bf16.mxu1 %v4866_v15  ;;  %v3212_v3 = vmul.f32 %v3194_v10, %v3098_v39 }
 0xd8a   : > { %v3211_v2 = vmul.f32 %v3193_v20, %v3093_v38  ;;  %4495 = vmatprep.mubr.msk.f32.mxu1 %vm1768_vm4, %v3227_v16 }
 0xd8b   : > { %v3230_v44 = vmul.f32 0.16666667, %v3212_v3  ;;  %4496 = vmatmul.mubr.msk.f32.gmra.mrb[52].mxu1 %vm1768_vm4, %v3228_v0 }
 0xd8c   : > { %4723 = vmatpush1.bf16.msra.mxu1 %v4722_v34  ;;  %v3229_v57 = vmul.f32 0.16666667, %v3211_v2 }
 0xd8d   : > { %4724 = vmatprep.subr.bf16.mxu1 %v4866_v15 }
 0xd8e   : > { %4498 = vmatprep.mubr.msk.f32.mxu1 %vm1768_vm4, %v3229_v57 }
 0xd8f   : > { %4499 = vmatmul.mubr.msk.f32.gmra.mrb[54].mxu1 %vm1768_vm4, %v3230_v44 }
 0xd90   : > { %4726 = vmatpush1.bf16.msra.mxu1 %v4725_v35 }
 0xd91   : > { %4727 = vmatprep.subr.bf16.mxu1 %v4866_v15 }
 0xdd6   : > { %v4779_v17 = vpop.permute.xlu0 %4778 }
 0xdd7   : > { %v4781_v21 = vunpack.i.h.bf16 %v4779_v17  ;;  %v4780_v37 = vunpack.i.l.bf16 %v4779_v17 }
 0xdd9   : > { %v4728_v28 = vpack.c.bf16 %v4781_v21, %v4780_v37 }
 0xdda   : > { %v4784_v13 = vpop.permute.xlu1 %4783 }
 0xddb   : > { %4729 = vmatpush1.bf16.msra.mxu1 %v4728_v28  ;;  %v4786_v11 = vunpack.i.h.bf16 %v4784_v13  ;;  %v4785_v43 = vunpack.i.l.bf16 %v4784_v13 }
 0xddc   : > { %4730 = vmatprep.subr.bf16.mxu1 %v4866_v15 }
 0xddd   : > { %v4731_v50 = vpack.c.bf16 %v4786_v11, %v4785_v43 }
 0xddf   : > { %4732 = vmatpush1.bf16.msra.mxu1 %v4731_v50 }
 0xde0   : > { %v4789_v40 = vpop.permute.xlu0 %4788  ;;  %4733 = vmatprep.subr.bf16.mxu1 %v4866_v15 }
 0xde1   : > { %v4791_v24 = vunpack.i.h.bf16 %v4789_v40  ;;  %v4790_v1 = vunpack.i.l.bf16 %v4789_v40 }
 0xde3   : > { %v4734_v19 = vpack.c.bf16 %v4791_v24, %v4790_v1 }
 0xde5   : > { %4735 = vmatpush1.bf16.msra.mxu1 %v4734_v19 }
 0xde6   : > { %4736 = vmatprep.subr.bf16.mxu1 %v4866_v15 }
 0xdea   : > { %v4794_v8 = vpop.permute.xlu1 %4793 }
 0xdeb   : > { %v4796_v9 = vunpack.i.h.bf16 %v4794_v8  ;;  %v4795_v41 = vunpack.i.l.bf16 %v4794_v8 }
 0xded   : > { %v4737_v60 = vpack.c.bf16 %v4796_v9, %v4795_v41 }
 0xdee   : > { %v4799_v25 = vpop.permute.xlu0 %4798 }
 0xdef   : > { %v4801_v14 = vunpack.i.h.bf16 %v4799_v25  ;;  %v4800_v23 = vunpack.i.l.bf16 %v4799_v25  ;;  %4738 = vmatpush1.bf16.msra.mxu1 %v4737_v60 }
 0xdf0   : > { %4739 = vmatprep.subr.bf16.mxu1 %v4866_v15 }
 0xdf1   : > { %v4740_v22 = vpack.c.bf16 %v4801_v14, %v4800_v23 }
 0xdf3   : > { %4741 = vmatpush1.bf16.msra.mxu1 %v4740_v22 }
 0xe36   : > { %v4460_v45 = vpop.f32.mrb[50].mxu0 }
 0xe37   : > { %v3108_v47 = vadd.f32 %v4460_v45, %v5874_v58  ;;  %v3102_v6 = vpop.f32.mrb[51].mxu0 }
 0xe38   : > { %v3103_v31 = vadd.f32 %v5874_v58, %v3102_v6 }
 0xe39   : > { %v3160_v29 = vadd.f32 3.0, %v3108_v47 }
 0xe3a   : > { %v3159_v7 = vadd.f32 3.0, %v3103_v31  ;;  %v4463_v26 = vpop.f32.mrb[52].mxu0 }
 0xe3b   : > { %v3178_v42 = vmax.f32 %v3160_v29, 0.0  ;;  %v3118_v39 = vadd.f32 %v4463_v26, %v5874_v58  ;;  %v3112_v27 = vpop.f32.mrb[53].mxu0 }
 0xe3c   : > { %v3177_v5 = vmax.f32 %v3159_v7, 0.0  ;;  %v3113_v32 = vadd.f32 %v5874_v58, %v3112_v27 }
 0xe3d   : > { %v3196_v56 = vmin.f32 %v3178_v42, 6.0  ;;  %v3162_v38 = vadd.f32 3.0, %v3118_v39 }
 0xe3e   : > { %v3195_v12 = vmin.f32 %v3177_v5, 6.0  ;;  %v3161_v18 = vadd.f32 3.0, %v3113_v32 }
 0xe3f   : > { %v3214_v53 = vmul.f32 %v3196_v56, %v3108_v47  ;;  %v3180_v52 = vmax.f32 %v3162_v38, 0.0 }
 0xe40   : > { %v3213_v36 = vmul.f32 %v3195_v12, %v3103_v31  ;;  %v4466_v49 = vpop.f32.mrb[54].mxu0  ;;  %v3179_v4 = vmax.f32 %v3161_v18, 0.0 }
 0xe41   : > { %v3232_v59 = vmul.f32 0.16666667, %v3214_v53  ;;  %v3128_v51 = vadd.f32 %v4466_v49, %v5874_v58  ;;  %v3122_v55 = vpop.f32.mrb[55].mxu0  ;;  %v3198_v63 = vmin.f32 %v3180_v52, 6.0  ;;  %v3933_v52 = vld [vmem:[%s5971_s13 + $0x18] sm:$0xff]  ;;  %v3459_v49 = vld [vmem:[%s5971_s13 + $0x8] sm:$0xff] }
 0xe42   : > { %v3231_v54 = vmul.f32 0.16666667, %v3213_v36  ;;  %v3123_v61 = vadd.f32 %v5874_v58, %v3122_v55  ;;  %v3197_v46 = vmin.f32 %v3179_v4, 6.0  ;;  %3934 = vmatprep.mubr.msk.f32.mxu0 %vm852_vm1, %v3933_v52 }
 0xe43   : > { %v3164_v33 = vadd.f32 3.0, %v3128_v51  ;;  %v3216_v62 = vmul.f32 %v3198_v63, %v3118_v39 }
 0xe44   : > { %4501 = vmatprep.mubr.msk.f32.mxu1 %vm1768_vm4, %v3231_v54  ;;  %v3163_v34 = vadd.f32 3.0, %v3123_v61  ;;  %v3215_v0 = vmul.f32 %v3197_v46, %v3113_v32 }
 0xe45   : > { %4502 = vmatmul.mubr.msk.f32.gmra.mrb[56].mxu1 %vm1768_vm4, %v3232_v59  ;;  %v3182_v10 = vmax.f32 %v3164_v33, 0.0  ;;  %v3234_v20 = vmul.f32 0.16666667, %v3216_v62  ;;  %v3458_v59 = vld [vmem:[%s5971_s13] sm:$0xff] }
 0xe46   : > { %v3181_v30 = vmax.f32 %v3163_v34, 0.0  ;;  %v3233_v48 = vmul.f32 0.16666667, %v3215_v0 }
 0xe47   : > { %v3200_v16 = vmin.f32 %v3182_v10, 6.0 }
 0xe48   : > { %v3199_v3 = vmin.f32 %v3181_v30, 6.0  ;;  %4504 = vmatprep.mubr.msk.f32.mxu1 %vm1768_vm4, %v3233_v48 }
 0xe49   : > { %v3218_v2 = vmul.f32 %v3200_v16, %v3128_v51  ;;  %4505 = vmatmul.mubr.msk.f32.gmra.mrb[58].mxu1 %vm1768_vm4, %v3234_v20 }
 0xe4a   : > { %v3217_v44 = vmul.f32 %v3199_v3, %v3123_v61  ;;  %v4469_v35 = vpop.f32.mrb[56].mxu0  ;;  %v3932_v3 = vld [vmem:[%s5971_s13 + $0x10] sm:$0xff] }
 0xe4b   : > { %v3138_v57 = vadd.f32 %v4469_v35, %v5874_v58  ;;  %v3132_v17 = vpop.f32.mrb[57].mxu0  ;;  %v3236_v28 = vmul.f32 0.16666667, %v3218_v2 }
 0xe4c   : > { %v3235_v21 = vmul.f32 0.16666667, %v3217_v44  ;;  %v3133_v37 = vadd.f32 %v5874_v58, %v3132_v17 }
 0xe4d   : > { %v3166_v13 = vadd.f32 3.0, %v3138_v57 }
 0xe4e   : > { %v3165_v11 = vadd.f32 3.0, %v3133_v37  ;;  %v4472_v43 = vpop.f32.mrb[58].mxu0  ;;  %4507 = vmatprep.mubr.msk.f32.mxu1 %vm1768_vm4, %v3235_v21 }
 0xe4f   : > { %v3184_v50 = vmax.f32 %v3166_v13, 0.0  ;;  %v3148_v40 = vadd.f32 %v4472_v43, %v5874_v58  ;;  %v3142_v24 = vpop.f32.mrb[59].mxu0  ;;  %4508 = vmatmul.mubr.msk.f32.gmra.mrb[60].mxu1 %vm1768_vm4, %v3236_v28 }
 0xe50   : > { %v3183_v1 = vmax.f32 %v3165_v11, 0.0  ;;  %v3143_v19 = vadd.f32 %v5874_v58, %v3142_v24 }
 0xe51   : > { %v3202_v8 = vmin.f32 %v3184_v50, 6.0  ;;  %v3168_v9 = vadd.f32 3.0, %v3148_v40 }
 0xe52   : > { %v3201_v41 = vmin.f32 %v3183_v1, 6.0  ;;  %v3167_v60 = vadd.f32 3.0, %v3143_v19 }
 0xe53   : > { %v3220_v25 = vmul.f32 %v3202_v8, %v3138_v57  ;;  %v3186_v14 = vmax.f32 %v3168_v9, 0.0  ;;  %v3663_v57 = vld [vmem:[%s5972_s14] sm:$0xff] }
 0xe54   : > { %v3219_v23 = vmul.f32 %v3201_v41, %v3133_v37  ;;  %v3185_v22 = vmax.f32 %v3167_v60, 0.0 }
 0xe55   : > { %v3204_v45 = vmin.f32 %v3186_v14, 6.0  ;;  %v3238_v29 = vmul.f32 0.16666667, %v3220_v25 }
 0xe56   : > { %v3237_v47 = vmul.f32 0.16666667, %v3219_v23  ;;  %v3203_v6 = vmin.f32 %v3185_v22, 6.0  ;;  %v4491_v31 = vpop.f32.mrb[48].mxu1 }
 0xe57   : > { %v3222_v7 = vmul.f32 %v3204_v45, %v3148_v40  ;;  %v3369_v42 = vpop.f32.mrb[49].mxu1 }
 0xe58   : > { %v3221_v5 = vmul.f32 %v3203_v6, %v3143_v19  ;;  %4510 = vmatprep.mubr.msk.f32.mxu1 %vm1768_vm4, %v3237_v47  ;;  %v4689_v56 = vpack.c.bf16 %v4491_v31, %v3369_v42 }
 0xe59   : > { %4511 = vmatmul.mubr.msk.f32.gmra.mrb[62].mxu1 %vm1768_vm4, %v3238_v29  ;;  %v3240_v12 = vmul.f32 0.16666667, %v3222_v7 }
 0xe5a   : > { %v3239_v58 = vmul.f32 0.16666667, %v3221_v5  ;;  %v4494_v26 = vpop.f32.mrb[50].mxu1  ;;  %4690 = vmatpush1.bf16.msra.mxu0 %v4689_v56 }
 0xe5b   : > { %v3379_v39 = vpop.f32.mrb[51].mxu1  ;;  %4691 = vmatprep.subr.bf16.mxu0 %v4866_v15 }
 0xe5c   : > { %4513 = vmatprep.mubr.msk.f32.mxu1 %vm1768_vm4, %v3239_v58  ;;  %v4692_v27 = vpack.c.bf16 %v4494_v26, %v3379_v39 }
 0xe5d   : > { %4514 = vmatmul.mubr.msk.f32.gmra.mrb[64].mxu1 %vm1768_vm4, %v3240_v12 }
 0xe5e   : > { %v4497_v53 = vpop.f32.mrb[52].mxu1  ;;  %4693 = vmatpush1.bf16.msra.mxu0 %v4692_v27  ;;  %3935 = vmatprep.mubr.msk.f32.mxu1 %vm852_vm1, %v3459_v49 }
 0xe5f   : > { %v3389_v32 = vpop.f32.mrb[53].mxu1  ;;  %4694 = vmatprep.subr.bf16.mxu0 %v4866_v15 }
 0xe60   : > { %v4695_v36 = vpack.c.bf16 %v4497_v53, %v3389_v32 }
 0xe61   : > { %3658 = vmatmul.mubr.f32.vlgmr.msra.gmra.mrb[66].mxu1 %v3458_v59 }
 0xe62   : > { %v4500_v38 = vpop.f32.mrb[54].mxu1  ;;  %4696 = vmatpush1.bf16.msra.mxu0 %v4695_v36 }
 0xe63   : > { %v3399_v18 = vpop.f32.mrb[55].mxu1  ;;  %4697 = vmatprep.subr.bf16.mxu0 %v4866_v15 }
 0xe64   : > { %v4698_v54 = vpack.c.bf16 %v4500_v38, %v3399_v18 }
 0xe66   : > { %4699 = vmatpush1.bf16.msra.mxu0 %v4698_v54 }
 0xe67   : > { %4700 = vmatprep.subr.bf16.mxu0 %v4866_v15 }
 0xf18   : > { %v4503_v4 = vpop.f32.mrb[56].mxu1 }
 0xf19   : > { %v3409_v51 = vpop.f32.mrb[57].mxu1 }
 0xf1a   : > { %v4701_v55 = vpack.c.bf16 %v4503_v4, %v3409_v51 }
 0xf1c   : > { %4702 = vmatpush1.bf16.msra.mxu0 %v4701_v55  ;;  %v4506_v63 = vpop.f32.mrb[58].mxu1 }
 0xf1d   : > { %4703 = vmatprep.subr.bf16.mxu0 %v4866_v15  ;;  %v3419_v61 = vpop.f32.mrb[59].mxu1 }
 0xf1e   : > { %v4704_v46 = vpack.c.bf16 %v4506_v63, %v3419_v61 }
 0xf20   : > { %4705 = vmatpush1.bf16.msra.mxu0 %v4704_v46 }
 0xf21   : > { %4706 = vmatprep.subr.bf16.mxu0 %v4866_v15 }
 0xf22   : > { %v4509_v33 = vpop.f32.mrb[60].mxu1 }
 0xf23   : > { %v3429_v62 = vpop.f32.mrb[61].mxu1 }
 0xf24   : > { %v4707_v34 = vpack.c.bf16 %v4509_v33, %v3429_v62 }
 0xf26   : > { %4708 = vmatpush1.bf16.msra.mxu0 %v4707_v34 }
 0xf27   : > { %4709 = vmatprep.subr.bf16.mxu0 %v4866_v15 }
 0xf2c   : > { %v4512_v0 = vpop.f32.mrb[62].mxu1 }
 0xf2d   : > { %v3439_v10 = vpop.f32.mrb[63].mxu1 }
 0xf2e   : > { %v4710_v30 = vpack.c.bf16 %v4512_v0, %v3439_v10 }
 0xf30   : > { %v4515_v48 = vpop.f32.mrb[64].mxu1  ;;  %4711 = vmatpush1.bf16.msra.mxu0 %v4710_v30 }
 0xf31   : > { %v3449_v16 = vpop.f32.mrb[65].mxu1  ;;  %4712 = vmatprep.subr.bf16.mxu0 %v4866_v15 }
 0xf32   : > { %v4713_v20 = vpack.c.bf16 %v4515_v48, %v3449_v16 }
 0xf34   : > { %4714 = vmatpush1.bf16.msra.mxu0 %v4713_v20  ;;  %v3659_v2 = vpop.f32.mrb[66].mxu1 }
 0xf35   : > { %v3661_v44 = vpop.f32.mrb[67].mxu1 }
 0xf37   : > { %3531 = vmatmul.mubr.f32.vlgmr.msra.gmra.mrb[60].mxu0 %v3932_v3 }
0x100a   : > { %v3532_v35 = vpop.f32.mrb[60].mxu0 }
0x100b   : > { %v3660_v17 = vadd.f32 %v3659_v2, %v3532_v35  ;;  %v3534_v21 = vpop.f32.mrb[61].mxu0 }
0x100d   : > { %v3664_v15 = vadd.f32 %v3663_v57, %v3660_v17 }
0x100f   : > { %3666 = vst.msk [vmem:[%s512_s30] sm:$0xff] %vm3665_vm14, %v3664_v15 }
0x1010 PF: > { %s25_s18 = sadd.s32 1, %s4862_s18  }
0x1011   : > { %p22_p4 = scmp.ge.s32.totalorder %s25_s18, 4  }
0x1013   :  { %24 = sbr.rel (!%p22_p4) target bundleno = 1 (0x1), region = 130 }

</bundles_post_ra>
